<compile_context>
chip_gen: v6e
topology: v6e:2x2x1
jax: 0.10.0
libtpu: 0.0.40
codegen_flags: <defaults>
</compile_context>

<pallas_src>
import jax
import jax.numpy as jnp
from jax.experimental import pallas as pl
from jax.experimental.pallas import tpu as pltpu


def _round_up(x, m):
    return (x + m - 1) // m * m


def decoder_kernel(x_ref, h_ref, enc_ref,
                   w_i3_ref, w_h3_ref, b_i3_ref, b_h3_ref,
                   wc_ref, b_c_ref, w_out_ref, b_out_ref,
                   probs_ref, hid_ref,
                   concat_sc, logit_sc, m_sc, l_sc):
    p = pl.program_id(1)            # 0 = project + online-softmax stats, 1 = normalize
    t = pl.program_id(2)            # vocab-tile index
    hp = hid_ref.shape[1]           # padded hidden size

    # ---- once per batch tile: GRU step, attention, concat projection ----
    @pl.when((p == 0) & (t == 0))
    def _rnn_attn():
        x = x_ref[...]                              # (TB, Hp) bf16 embedded input
        h = h_ref[...]                              # (TB, Hp) f32 previous hidden
        # fused GRU gate matmuls: x @ W_i[r|z|n], h @ W_h[r|z|n]
        xi = jnp.dot(x, w_i3_ref[...],
                     preferred_element_type=jnp.float32) + b_i3_ref[...]
        hh = jnp.dot(h.astype(jnp.bfloat16), w_h3_ref[...],
                     preferred_element_type=jnp.float32) + b_h3_ref[...]
        r = jax.nn.sigmoid(xi[:, 0:hp] + hh[:, 0:hp])
        z = jax.nn.sigmoid(xi[:, hp:2 * hp] + hh[:, hp:2 * hp])
        n = jnp.tanh(xi[:, 2 * hp:3 * hp] + r * hh[:, 2 * hp:3 * hp])
        h_new = (1.0 - z) * n + z * h               # (TB, Hp) f32
        hid_ref[...] = h_new

        # Luong 'dot' attention as batched MXU matmuls.
        enc = enc_ref[...]                          # (TB, S, Hp) bf16
        q = h_new.astype(jnp.bfloat16)[:, None, :]  # (TB, 1, Hp)
        scores = jnp.einsum('bqh,bsh->bqs', q, enc,
                            preferred_element_type=jnp.float32)        # (TB,1,S)
        scores = scores - jnp.max(scores, axis=-1, keepdims=True)
        e = jnp.exp(scores)
        attn = e * pl.reciprocal(jnp.sum(e, axis=-1, keepdims=True), approx=True)
        ctx = jnp.einsum('bqs,bsh->bqh', attn.astype(jnp.bfloat16), enc,
                         preferred_element_type=jnp.float32)[:, 0, :]   # (TB,Hp)

        # fused concat Linear(2H -> H) + tanh
        cat = jnp.concatenate([h_new, ctx], axis=1).astype(jnp.bfloat16)  # (TB,2Hp)
        concat_sc[...] = jnp.tanh(
            jnp.dot(cat, wc_ref[...], preferred_element_type=jnp.float32)
            + b_c_ref[...]).astype(jnp.bfloat16)

        # init online-softmax statistics for the vocab loop
        m_sc[...] = jnp.full_like(m_sc, -1e30)
        l_sc[...] = jnp.zeros_like(l_sc)

    # ---- pass 0, every vocab tile: output projection + online max / sum-exp ----
    @pl.when(p == 0)
    def _project():
        logits = jnp.dot(concat_sc[...], w_out_ref[...],
                         preferred_element_type=jnp.float32) + b_out_ref[...]  # (TB,TILE_V)
        logit_sc[t] = logits                        # keep raw logits resident in VMEM
        m_prev = m_sc[...]
        m_new = jnp.maximum(m_prev, jnp.max(logits, axis=1, keepdims=True))
        l_sc[...] = (l_sc[...] * jnp.exp(m_prev - m_new)
                     + jnp.sum(jnp.exp(logits - m_new), axis=1, keepdims=True))
        m_sc[...] = m_new

    # ---- pass 1, every vocab tile: exact softmax normalize, lane-dense store ----
    @pl.when(p == 1)
    def _normalize():
        probs_ref[...] = jnp.exp(logit_sc[t] - m_sc[...]) / l_sc[...]


def luong_decoder_forward(input_step, last_hidden, encoder_outputs, params):
    """input_step: (1, B) int32; last_hidden: (1, B, H); encoder_outputs: (S, B, H)."""
    f32, bf16 = jnp.float32, jnp.bfloat16

    emb = params['embedding'][input_step[0]]        # (B, H) gather — plain JAX glue
    h0 = last_hidden[0]                             # (B, H)
    S, B, H = encoder_outputs.shape
    V = params['w_out'].shape[1]

    # ---- lane/sublane-dense padded shapes & tiling ----
    Hp = _round_up(H, 128)
    TILE_V = min(_round_up(V, 128), 2048)
    V_pad = _round_up(V, TILE_V)
    B_pad = _round_up(B, 8)
    if B_pad > 128:
        B_pad = _round_up(B_pad, 128)
        TILE_B = 128
    else:
        TILE_B = B_pad
    nb, nv = B_pad // TILE_B, V_pad // TILE_V
    dh = Hp - H

    def padw(w):   # (H, H) -> (Hp, Hp), zero padded
        return jnp.pad(w, ((0, dh), (0, dh)))

    def padb(b):   # (1, H) -> (1, Hp)
        return jnp.pad(b, ((0, 0), (0, dh)))

    # fused GRU weights (gate order r, z, n)
    w_i3 = jnp.concatenate([padw(params['w_ir']), padw(params['w_iz']),
                            padw(params['w_in'])], axis=1).astype(bf16)
    w_h3 = jnp.concatenate([padw(params['w_hr']), padw(params['w_hz']),
                            padw(params['w_hn'])], axis=1).astype(bf16)
    b_i3 = jnp.concatenate([padb(params['b_ir']), padb(params['b_iz']),
                            padb(params['b_in'])], axis=1).astype(f32)
    b_h3 = jnp.concatenate([padb(params['b_hr']), padb(params['b_hz']),
                            padb(params['b_hn'])], axis=1).astype(f32)
    # fused concat Linear: rows [0:Hp) act on rnn_output, rows [Hp:2Hp) on context
    wc = jnp.concatenate([padw(params['wc_h']), padw(params['wc_c'])],
                         axis=0).astype(bf16)
    b_c = padb(params['b_c']).astype(f32)
    w_out = jnp.pad(params['w_out'], ((0, dh), (0, V_pad - V))).astype(bf16)
    # padded vocab columns get a -1e30 bias so they never contribute to the softmax
    b_out = jnp.pad(params['b_out'], ((0, 0), (0, V_pad - V)),
                    constant_values=-1e30).astype(f32)

    x_p = jnp.pad(emb, ((0, B_pad - B), (0, dh))).astype(bf16)
    h_p = jnp.pad(h0, ((0, B_pad - B), (0, dh))).astype(f32)
    # TODO(synk): fold this (S,B,H)->(B,S,H) transpose into the encoder's output layout
    # so the pad+transpose copy of encoder_outputs is not repeated every decode step.
    enc = jnp.transpose(encoder_outputs, (1, 0, 2))
    enc_p = jnp.pad(enc, ((0, B_pad - B), (0, 0), (0, dh))).astype(bf16)

    const3 = lambda b, p, t: (0, 0)
    # vocab-tile index map: pass 0 walks the tiles, pass 1 parks on the last tile
    # (block index unchanged => no redundant w_out DMA during the normalize pass).
    wout_map = lambda b, p, t: (0, t * (1 - p) + (nv - 1) * p)
    # probs output: parked on tile 0 during pass 0 (never written), streamed in pass 1.
    probs_map = lambda b, p, t: (b, t * p)

    in_specs = [
        pl.BlockSpec((TILE_B, Hp), lambda b, p, t: (b, 0)),         # x (embedded step)
        pl.BlockSpec((TILE_B, Hp), lambda b, p, t: (b, 0)),         # previous hidden
        pl.BlockSpec((TILE_B, S, Hp), lambda b, p, t: (b, 0, 0)),   # encoder outputs
        pl.BlockSpec((Hp, 3 * Hp), const3),                         # W_i[r|z|n]
        pl.BlockSpec((Hp, 3 * Hp), const3),                         # W_h[r|z|n]
        pl.BlockSpec((1, 3 * Hp), const3),                          # b_i[r|z|n]
        pl.BlockSpec((1, 3 * Hp), const3),                          # b_h[r|z|n]
        pl.BlockSpec((2 * Hp, Hp), const3),                         # concat weight
        pl.BlockSpec((1, Hp), const3),                              # concat bias
        pl.BlockSpec((Hp, TILE_V), wout_map),                       # w_out tile (streams)
        pl.BlockSpec((1, TILE_V), wout_map),                        # b_out tile
    ]
    out_specs = (
        pl.BlockSpec((TILE_B, TILE_V), probs_map),                  # softmax probabilities
        pl.BlockSpec((TILE_B, Hp), lambda b, p, t: (b, 0)),         # new hidden
    )
    out_shape = (
        jax.ShapeDtypeStruct((B_pad, V_pad), f32),
        jax.ShapeDtypeStruct((B_pad, Hp), f32),
    )

    flops = B_pad * (16 * Hp * Hp + 4 * S * Hp + 2 * Hp * V_pad)
    transcendentals = B_pad * (4 * Hp + 2 * S + 2 * V_pad)
    bytes_accessed = (x_p.size * 2 + h_p.size * 4 + enc_p.size * 2
                      + (w_i3.size + w_h3.size + wc.size + w_out.size) * 2
                      + (b_i3.size + b_h3.size + b_c.size + b_out.size) * 4
                      + B_pad * V_pad * 4 + B_pad * Hp * 4)

    # TODO(synk): for very large vocab x large batch tiles the (nv, TILE_B, TILE_V) f32
    # logits slab may outgrow VMEM; fall back to streaming raw logits + wrapper finalize.
    probs, hid = pl.pallas_call(
        decoder_kernel,
        out_shape=out_shape,
        grid_spec=pltpu.PrefetchScalarGridSpec(
            num_scalar_prefetch=0,
            grid=(nb, 2, nv),
            in_specs=in_specs,
            out_specs=out_specs,
            scratch_shapes=[
                pltpu.VMEM((TILE_B, Hp), bf16),            # concat_output cache
                pltpu.VMEM((nv, TILE_B, TILE_V), f32),     # VMEM-resident raw logits
                pltpu.VMEM((TILE_B, 1), f32),              # running row max
                pltpu.VMEM((TILE_B, 1), f32),              # running sum-exp
            ]),
        compiler_params=pltpu.CompilerParams(
            dimension_semantics=("parallel", "arbitrary", "arbitrary"),
            vmem_limit_bytes=64 * 1024 * 1024,
        ),
        cost_estimate=pl.CostEstimate(flops=flops,
                                      transcendentals=transcendentals,
                                      bytes_accessed=bytes_accessed),
        input_output_aliases={1: 1},   # previous hidden buffer reused for new hidden
    )(x_p, h_p, enc_p, w_i3, w_h3, b_i3, b_h3, wc, b_c, w_out, b_out)

    out = probs[:B, :V]                 # already exact, fully-normalized softmax
    hidden = hid[:B, :H][None]
    return out, hidden


def reference_forward(input_step, last_hidden, encoder_outputs, params):
    """Pure-JAX f32 reference mirroring the PyTorch forward."""
    emb = params['embedding'][input_step[0]]
    h = last_hidden[0]
    r = jax.nn.sigmoid(emb @ params['w_ir'] + params['b_ir']
                       + h @ params['w_hr'] + params['b_hr'])
    z = jax.nn.sigmoid(emb @ params['w_iz'] + params['b_iz']
                       + h @ params['w_hz'] + params['b_hz'])
    n = jnp.tanh(emb @ params['w_in'] + params['b_in']
                 + r * (h @ params['w_hn'] + params['b_hn']))
    h_new = (1.0 - z) * n + z * h
    enc = jnp.transpose(encoder_outputs, (1, 0, 2))
    scores = jnp.sum(h_new[:, None, :] * enc, axis=2)
    attn = jax.nn.softmax(scores, axis=1)
    context = jnp.sum(attn[:, :, None] * enc, axis=1)
    concat_out = jnp.tanh(h_new @ params['wc_h'] + context @ params['wc_c']
                          + params['b_c'])
    out = jax.nn.softmax(concat_out @ params['w_out'] + params['b_out'], axis=1)
    return out, h_new[None]


def init_params(key, num_embeddings, hidden_size, output_size):
    H, V = hidden_size, output_size
    keys = jax.random.split(key, 18)
    s = 1.0 / float(H) ** 0.5

    def mat(k, shape, scale):
        return jax.random.normal(k, shape, jnp.float32) * scale

    return {
        'embedding': mat(keys[0], (num_embeddings, H), 0.1),
        # GRU: x @ W_i* and h @ W_h* (transposed relative to PyTorch storage)
        'w_ir': mat(keys[1], (H, H), s), 'w_iz': mat(keys[2], (H, H), s),
        'w_in': mat(keys[3], (H, H), s),
        'w_hr': mat(keys[4], (H, H), s), 'w_hz': mat(keys[5], (H, H), s),
        'w_hn': mat(keys[6], (H, H), s),
        'b_ir': mat(keys[7], (1, H), s), 'b_iz': mat(keys[8], (1, H), s),
        'b_in': mat(keys[9], (1, H), s),
        'b_hr': mat(keys[10], (1, H), s), 'b_hz': mat(keys[11], (1, H), s),
        'b_hn': mat(keys[12], (1, H), s),
        # concat Linear(2H -> H), split into rnn_output / context halves
        'wc_h': mat(keys[13], (H, H), s), 'wc_c': mat(keys[14], (H, H), s),
        'b_c': mat(keys[15], (1, H), s),
        # out Linear(H -> V)
        'w_out': mat(keys[16], (H, V), s), 'b_out': mat(keys[17], (1, V), s),
    }


if __name__ == "__main__":
    B, H, S, V = 2, 32, 8, 16
    NUM_EMB = 20

    key = jax.random.PRNGKey(0)
    k_par, k_tok, k_hid, k_enc = jax.random.split(key, 4)

    params = init_params(k_par, NUM_EMB, H, V)
    input_step = jax.random.randint(k_tok, (1, B), 0, NUM_EMB, dtype=jnp.int32)
    last_hidden = jax.random.normal(k_hid, (1, B, H), jnp.float32)
    encoder_outputs = jax.random.normal(k_enc, (S, B, H), jnp.float32)

    out, hidden = jax.jit(luong_decoder_forward)(
        input_step, last_hidden, encoder_outputs, params)
    jax.block_until_ready((out, hidden))

    ref_out, ref_hidden = reference_forward(
        input_step, last_hidden, encoder_outputs, params)

    assert out.shape == (B, V) and hidden.shape == (1, B, H)
    # bf16 matmul inputs (f32 accumulation) => compare to f32 reference loosely
    assert jnp.allclose(out, ref_out, atol=3e-2, rtol=3e-2)
    assert jnp.allclose(hidden, ref_hidden, atol=3e-2, rtol=3e-2)
    # in-kernel softmax normalization is exact f32
    assert jnp.allclose(jnp.sum(out, axis=1), 1.0, atol=1e-4)

    print("KERNEL_OK")
</pallas_src>

<mosaic_0001>
module attributes {stable_mosaic.version = 11 : i64} {
  func.func @decoder_kernel(%arg0: i32, %arg1: i32, %arg2: i32, %arg3: memref<8x128xbf16, #tpu.memory_space<vmem>>, %arg4: memref<8x128xf32, #tpu.memory_space<vmem>>, %arg5: memref<8x8x128xbf16, #tpu.memory_space<vmem>>, %arg6: memref<128x384xbf16, #tpu.memory_space<vmem>>, %arg7: memref<128x384xbf16, #tpu.memory_space<vmem>>, %arg8: memref<1x384xf32, #tpu.memory_space<vmem>>, %arg9: memref<1x384xf32, #tpu.memory_space<vmem>>, %arg10: memref<256x128xbf16, #tpu.memory_space<vmem>>, %arg11: memref<1x128xf32, #tpu.memory_space<vmem>>, %arg12: memref<128x128xbf16, #tpu.memory_space<vmem>>, %arg13: memref<1x128xf32, #tpu.memory_space<vmem>>, %arg14: memref<8x128xf32, #tpu.memory_space<vmem>>, %arg15: memref<8x128xf32, #tpu.memory_space<vmem>>, %arg16: memref<8x128xbf16, #tpu.memory_space<vmem>>, %arg17: memref<1x8x128xf32, #tpu.memory_space<vmem>>, %arg18: memref<8x1xf32, #tpu.memory_space<vmem>>, %arg19: memref<8x1xf32, #tpu.memory_space<vmem>>) attributes {dimension_semantics = [#tpu.dimension_semantics<parallel>, #tpu.dimension_semantics<arbitrary>, #tpu.dimension_semantics<arbitrary>], iteration_bounds = array<i64: 1, 2, 1>, scalar_prefetch = 0 : i64, scratch_operands = 4 : i64, tpu.core_type = #tpu.core_type<tc>, window_params = [{transform_indices = @transform_0, window_bounds = array<i64: 8, 128>}, {transform_indices = @transform_1, window_bounds = array<i64: 8, 128>}, {transform_indices = @transform_2, window_bounds = array<i64: 8, 8, 128>}, {pipeline_mode = #tpu.pipeline_mode<synchronous>, transform_indices = @transform_3, window_bounds = array<i64: 128, 384>}, {pipeline_mode = #tpu.pipeline_mode<synchronous>, transform_indices = @transform_4, window_bounds = array<i64: 128, 384>}, {pipeline_mode = #tpu.pipeline_mode<synchronous>, transform_indices = @transform_5, window_bounds = array<i64: 1, 384>}, {pipeline_mode = #tpu.pipeline_mode<synchronous>, transform_indices = @transform_6, window_bounds = array<i64: 1, 384>}, {pipeline_mode = #tpu.pipeline_mode<synchronous>, transform_indices = @transform_7, window_bounds = array<i64: 256, 128>}, {pipeline_mode = #tpu.pipeline_mode<synchronous>, transform_indices = @transform_8, window_bounds = array<i64: 1, 128>}, {transform_indices = @transform_9, window_bounds = array<i64: 128, 128>}, {transform_indices = @transform_10, window_bounds = array<i64: 1, 128>}, {transform_indices = @transform_11, window_bounds = array<i64: 8, 128>}, {transform_indices = @transform_12, window_bounds = array<i64: 8, 128>}]} {
    %c0_i32 = arith.constant 0 : i32
    %0 = arith.cmpi eq, %arg1, %c0_i32 : i32
    %c0_i32_0 = arith.constant 0 : i32
    %1 = arith.cmpi eq, %arg2, %c0_i32_0 : i32
    %2 = arith.andi %0, %1 : i1
    %3 = arith.extui %2 : i1 to i32
    %c0_i32_1 = arith.constant 0 : i32
    %4 = arith.cmpi ne, %3, %c0_i32_1 : i32
    scf.if %4 {
      %c0 = arith.constant 0 : index
      %c0_5 = arith.constant 0 : index
      %11 = vector.load %arg3[%c0, %c0_5] : memref<8x128xbf16, #tpu.memory_space<vmem>>, vector<8x128xbf16>
      %c0_6 = arith.constant 0 : index
      %c0_7 = arith.constant 0 : index
      %12 = vector.load %arg4[%c0_6, %c0_7] : memref<8x128xf32, #tpu.memory_space<vmem>>, vector<8x128xf32>
      %c0_8 = arith.constant 0 : index
      %c0_9 = arith.constant 0 : index
      %13 = vector.load %arg6[%c0_8, %c0_9] : memref<128x384xbf16, #tpu.memory_space<vmem>>, vector<128x384xbf16>
      %cst = arith.constant dense<0.000000e+00> : vector<8x384xf32>
      %14 = tpu.matmul %11, %13, %cst {dimension_numbers = #tpu.dot_dimension_numbers<[1], [0], [0], [1], [0, 0, 1, 1], [], []>} : vector<8x128xbf16>, vector<128x384xbf16>, vector<8x384xf32> -> vector<8x384xf32>
      %c0_10 = arith.constant 0 : index
      %c0_11 = arith.constant 0 : index
      %15 = vector.load %arg8[%c0_10, %c0_11] : memref<1x384xf32, #tpu.memory_space<vmem>>, vector<1x384xf32>
      %16 = vector.broadcast %15 : vector<1x384xf32> to vector<8x384xf32>
      %17 = arith.addf %14, %16 : vector<8x384xf32>
      %18 = arith.truncf %12 : vector<8x128xf32> to vector<8x128xbf16>
      %c0_12 = arith.constant 0 : index
      %c0_13 = arith.constant 0 : index
      %19 = vector.load %arg7[%c0_12, %c0_13] : memref<128x384xbf16, #tpu.memory_space<vmem>>, vector<128x384xbf16>
      %cst_14 = arith.constant dense<0.000000e+00> : vector<8x384xf32>
      %20 = tpu.matmul %18, %19, %cst_14 {dimension_numbers = #tpu.dot_dimension_numbers<[1], [0], [0], [1], [0, 0, 1, 1], [], []>} : vector<8x128xbf16>, vector<128x384xbf16>, vector<8x384xf32> -> vector<8x384xf32>
      %c0_15 = arith.constant 0 : index
      %c0_16 = arith.constant 0 : index
      %21 = vector.load %arg9[%c0_15, %c0_16] : memref<1x384xf32, #tpu.memory_space<vmem>>, vector<1x384xf32>
      %22 = vector.broadcast %21 : vector<1x384xf32> to vector<8x384xf32>
      %23 = arith.addf %20, %22 : vector<8x384xf32>
      %24 = vector.extract_strided_slice %17 {offsets = [0, 0], sizes = [8, 128], strides = [1, 1]} : vector<8x384xf32> to vector<8x128xf32>
      %25 = vector.extract_strided_slice %23 {offsets = [0, 0], sizes = [8, 128], strides = [1, 1]} : vector<8x384xf32> to vector<8x128xf32>
      %26 = arith.addf %24, %25 : vector<8x128xf32>
      %27 = arith.negf %26 : vector<8x128xf32>
      %28 = math.exp %27 : vector<8x128xf32>
      %cst_17 = arith.constant 1.000000e+00 : f32
      %29 = vector.broadcast %cst_17 : f32 to vector<8x128xf32>
      %30 = arith.addf %29, %28 : vector<8x128xf32>
      %31 = arith.divf %29, %30 : vector<8x128xf32>
      %32 = vector.extract_strided_slice %17 {offsets = [0, 128], sizes = [8, 128], strides = [1, 1]} : vector<8x384xf32> to vector<8x128xf32>
      %33 = vector.extract_strided_slice %23 {offsets = [0, 128], sizes = [8, 128], strides = [1, 1]} : vector<8x384xf32> to vector<8x128xf32>
      %34 = arith.addf %32, %33 : vector<8x128xf32>
      %35 = arith.negf %34 : vector<8x128xf32>
      %36 = math.exp %35 : vector<8x128xf32>
      %cst_18 = arith.constant 1.000000e+00 : f32
      %37 = vector.broadcast %cst_18 : f32 to vector<8x128xf32>
      %38 = arith.addf %37, %36 : vector<8x128xf32>
      %39 = arith.divf %37, %38 : vector<8x128xf32>
      %40 = vector.extract_strided_slice %17 {offsets = [0, 256], sizes = [8, 128], strides = [1, 1]} : vector<8x384xf32> to vector<8x128xf32>
      %41 = vector.extract_strided_slice %23 {offsets = [0, 256], sizes = [8, 128], strides = [1, 1]} : vector<8x384xf32> to vector<8x128xf32>
      %42 = arith.mulf %31, %41 : vector<8x128xf32>
      %43 = arith.addf %40, %42 : vector<8x128xf32>
      %44 = math.tanh %43 : vector<8x128xf32>
      %cst_19 = arith.constant 1.000000e+00 : f32
      %45 = vector.broadcast %cst_19 : f32 to vector<8x128xf32>
      %46 = arith.subf %45, %39 : vector<8x128xf32>
      %47 = arith.mulf %46, %44 : vector<8x128xf32>
      %48 = arith.mulf %39, %12 : vector<8x128xf32>
      %49 = arith.addf %47, %48 : vector<8x128xf32>
      %c0_20 = arith.constant 0 : index
      %c0_21 = arith.constant 0 : index
      %50 = vector.load %arg15[%c0_20, %c0_21] : memref<8x128xf32, #tpu.memory_space<vmem>>, vector<8x128xf32>
      tpu.vector_store %arg15[%c0_20, %c0_21], %49 {strides = array<i32>} : memref<8x128xf32, #tpu.memory_space<vmem>>, vector<8x128xf32>,
      %c0_22 = arith.constant 0 : index
      %c0_23 = arith.constant 0 : index
      %c0_24 = arith.constant 0 : index
      %51 = vector.load %arg5[%c0_22, %c0_23, %c0_24] : memref<8x8x128xbf16, #tpu.memory_space<vmem>>, vector<8x8x128xbf16>
      %52 = arith.truncf %49 : vector<8x128xf32> to vector<8x128xbf16>
      %53 = vector.shape_cast %52 : vector<8x128xbf16> to vector<8x1x128xbf16>
      "tpu.trace_start"() <{level = 10 : i32, message = "bqh,bsh->bqs"}> : () -> ()
      %cst_25 = arith.constant dense<0.000000e+00> : vector<8x1x8xf32>
      %54 = tpu.matmul %53, %51, %cst_25 {dimension_numbers = #tpu.dot_dimension_numbers<[2], [2], [1], [1], [0, 0, 0, 1, 1, 1], [0], [0]>} : vector<8x1x128xbf16>, vector<8x8x128xbf16>, vector<8x1x8xf32> -> vector<8x1x8xf32>
      "tpu.trace_stop"() : () -> ()
      %cst_26 = arith.constant dense<0xFF800000> : vector<8x1xf32>
      %55 = vector.multi_reduction <maximumf>, %54, %cst_26 [2] : vector<8x1x8xf32> to vector<8x1xf32>
      %56 = vector.shape_cast %55 : vector<8x1xf32> to vector<8x1x1xf32>
      %57 = vector.broadcast %56 : vector<8x1x1xf32> to vector<8x1x8xf32>
      %58 = arith.subf %54, %57 : vector<8x1x8xf32>
      %59 = math.exp %58 : vector<8x1x8xf32>
      %cst_27 = arith.constant dense<0.000000e+00> : vector<8x1xf32>
      %60 = vector.multi_reduction <add>, %59, %cst_27 [2] : vector<8x1x8xf32> to vector<8x1xf32>
      %61 = vector.shape_cast %60 : vector<8x1xf32> to vector<8x1x1xf32>
      %62 = tpu.reciprocal %61 {approx = true} : vector<8x1x1xf32> -> vector<8x1x1xf32>
      %63 = vector.broadcast %62 : vector<8x1x1xf32> to vector<8x1x8xf32>
      %64 = arith.mulf %59, %63 : vector<8x1x8xf32>
      %65 = arith.truncf %64 : vector<8x1x8xf32> to vector<8x1x8xbf16>
      "tpu.trace_start"() <{level = 10 : i32, message = "bqs,bsh->bqh"}> : () -> ()
      %cst_28 = arith.constant dense<0.000000e+00> : vector<8x1x128xf32>
      %66 = tpu.matmul %65, %51, %cst_28 {dimension_numbers = #tpu.dot_dimension_numbers<[2], [1], [1], [2], [0, 0, 0, 1, 1, 2], [0], [0]>} : vector<8x1x8xbf16>, vector<8x8x128xbf16>, vector<8x1x128xf32> -> vector<8x1x128xf32>
      "tpu.trace_stop"() : () -> ()
      %67 = vector.shape_cast %66 : vector<8x1x128xf32> to vector<8x128xf32>
      %68 = tpu.concatenate %49, %67 in 1 : vector<8x128xf32>, vector<8x128xf32> -> vector<8x256xf32>
      %69 = arith.truncf %68 : vector<8x256xf32> to vector<8x256xbf16>
      %c0_29 = arith.constant 0 : index
      %c0_30 = arith.constant 0 : index
      %70 = vector.load %arg10[%c0_29, %c0_30] : memref<256x128xbf16, #tpu.memory_space<vmem>>, vector<256x128xbf16>
      %cst_31 = arith.constant dense<0.000000e+00> : vector<8x128xf32>
      %71 = tpu.matmul %69, %70, %cst_31 {dimension_numbers = #tpu.dot_dimension_numbers<[1], [0], [0], [1], [0, 0, 1, 1], [], []>} : vector<8x256xbf16>, vector<256x128xbf16>, vector<8x128xf32> -> vector<8x128xf32>
      %c0_32 = arith.constant 0 : index
      %c0_33 = arith.constant 0 : index
      %72 = vector.load %arg11[%c0_32, %c0_33] : memref<1x128xf32, #tpu.memory_space<vmem>>, vector<1x128xf32>
      %73 = vector.broadcast %72 : vector<1x128xf32> to vector<8x128xf32>
      %74 = arith.addf %71, %73 : vector<8x128xf32>
      %75 = math.tanh %74 : vector<8x128xf32>
      %76 = arith.truncf %75 : vector<8x128xf32> to vector<8x128xbf16>
      %c0_34 = arith.constant 0 : index
      %c0_35 = arith.constant 0 : index
      %77 = vector.load %arg16[%c0_34, %c0_35] : memref<8x128xbf16, #tpu.memory_space<vmem>>, vector<8x128xbf16>
      tpu.vector_store %arg16[%c0_34, %c0_35], %76 {strides = array<i32>} : memref<8x128xbf16, #tpu.memory_space<vmem>>, vector<8x128xbf16>,
      %cst_36 = arith.constant -1.000000e+30 : f32
      %78 = vector.broadcast %cst_36 : f32 to vector<8x1xf32>
      %c0_37 = arith.constant 0 : index
      %c0_38 = arith.constant 0 : index
      %79 = vector.load %arg18[%c0_37, %c0_38] : memref<8x1xf32, #tpu.memory_space<vmem>>, vector<8x1xf32>
      tpu.vector_store %arg18[%c0_37, %c0_38], %78 {strides = array<i32>} : memref<8x1xf32, #tpu.memory_space<vmem>>, vector<8x1xf32>,
      %cst_39 = arith.constant 0.000000e+00 : f32
      %80 = vector.broadcast %cst_39 : f32 to vector<8x1xf32>
      %c0_40 = arith.constant 0 : index
      %c0_41 = arith.constant 0 : index
      %81 = vector.load %arg19[%c0_40, %c0_41] : memref<8x1xf32, #tpu.memory_space<vmem>>, vector<8x1xf32>
      tpu.vector_store %arg19[%c0_40, %c0_41], %80 {strides = array<i32>} : memref<8x1xf32, #tpu.memory_space<vmem>>, vector<8x1xf32>,
    } else {
    }
    %c0_i32_2 = arith.constant 0 : i32
    %5 = arith.cmpi eq, %arg1, %c0_i32_2 : i32
    %6 = arith.extui %5 : i1 to i32
    %c0_i32_3 = arith.constant 0 : i32
    %7 = arith.cmpi ne, %6, %c0_i32_3 : i32
    scf.if %7 {
      %c0 = arith.constant 0 : index
      %c0_5 = arith.constant 0 : index
      %11 = vector.load %arg16[%c0, %c0_5] : memref<8x128xbf16, #tpu.memory_space<vmem>>, vector<8x128xbf16>
      %c0_6 = arith.constant 0 : index
      %c0_7 = arith.constant 0 : index
      %12 = vector.load %arg12[%c0_6, %c0_7] : memref<128x128xbf16, #tpu.memory_space<vmem>>, vector<128x128xbf16>
      %cst = arith.constant dense<0.000000e+00> : vector<8x128xf32>
      %13 = tpu.matmul %11, %12, %cst {dimension_numbers = #tpu.dot_dimension_numbers<[1], [0], [0], [1], [0, 0, 1, 1], [], []>} : vector<8x128xbf16>, vector<128x128xbf16>, vector<8x128xf32> -> vector<8x128xf32>
      %c0_8 = arith.constant 0 : index
      %c0_9 = arith.constant 0 : index
      %14 = vector.load %arg13[%c0_8, %c0_9] : memref<1x128xf32, #tpu.memory_space<vmem>>, vector<1x128xf32>
      %15 = vector.broadcast %14 : vector<1x128xf32> to vector<8x128xf32>
      %16 = arith.addf %13, %15 : vector<8x128xf32>
      %17 = arith.index_cast %arg2 : i32 to index
      %c0_10 = arith.constant 0 : index
      %c0_11 = arith.constant 0 : index
      %18 = vector.load %arg17[%17, %c0_10, %c0_11] : memref<1x8x128xf32, #tpu.memory_space<vmem>>, vector<1x8x128xf32>
      %19 = vector.shape_cast %18 : vector<1x8x128xf32> to vector<8x128xf32>
      %20 = vector.shape_cast %16 : vector<8x128xf32> to vector<1x8x128xf32>
      tpu.vector_store %arg17[%17, %c0_10, %c0_11], %20 {strides = array<i32>} : memref<1x8x128xf32, #tpu.memory_space<vmem>>, vector<1x8x128xf32>,
      %c0_12 = arith.constant 0 : index
      %c0_13 = arith.constant 0 : index
      %21 = vector.load %arg18[%c0_12, %c0_13] : memref<8x1xf32, #tpu.memory_space<vmem>>, vector<8x1xf32>
      %cst_14 = arith.constant dense<0xFF800000> : vector<8xf32>
      %22 = vector.multi_reduction <maximumf>, %16, %cst_14 [1] : vector<8x128xf32> to vector<8xf32>
      %23 = vector.shape_cast %22 : vector<8xf32> to vector<8x1xf32>
      %24 = arith.maximumf %21, %23 : vector<8x1xf32>
      %c0_15 = arith.constant 0 : index
      %c0_16 = arith.constant 0 : index
      %25 = vector.load %arg19[%c0_15, %c0_16] : memref<8x1xf32, #tpu.memory_space<vmem>>, vector<8x1xf32>
      %26 = arith.subf %21, %24 : vector<8x1xf32>
      %27 = math.exp %26 : vector<8x1xf32>
      %28 = arith.mulf %25, %27 : vector<8x1xf32>
      %29 = vector.broadcast %24 : vector<8x1xf32> to vector<8x128xf32>
      %30 = arith.subf %16, %29 : vector<8x128xf32>
      %31 = math.exp %30 : vector<8x128xf32>
      %cst_17 = arith.constant dense<0.000000e+00> : vector<8xf32>
      %32 = vector.multi_reduction <add>, %31, %cst_17 [1] : vector<8x128xf32> to vector<8xf32>
      %33 = vector.shape_cast %32 : vector<8xf32> to vector<8x1xf32>
      %34 = arith.addf %28, %33 : vector<8x1xf32>
      %c0_18 = arith.constant 0 : index
      %c0_19 = arith.constant 0 : index
      %35 = vector.load %arg19[%c0_18, %c0_19] : memref<8x1xf32, #tpu.memory_space<vmem>>, vector<8x1xf32>
      tpu.vector_store %arg19[%c0_18, %c0_19], %34 {strides = array<i32>} : memref<8x1xf32, #tpu.memory_space<vmem>>, vector<8x1xf32>,
      %c0_20 = arith.constant 0 : index
      %c0_21 = arith.constant 0 : index
      %36 = vector.load %arg18[%c0_20, %c0_21] : memref<8x1xf32, #tpu.memory_space<vmem>>, vector<8x1xf32>
      tpu.vector_store %arg18[%c0_20, %c0_21], %24 {strides = array<i32>} : memref<8x1xf32, #tpu.memory_space<vmem>>, vector<8x1xf32>,
    } else {
    }
    %c1_i32 = arith.constant 1 : i32
    %8 = arith.cmpi eq, %arg1, %c1_i32 : i32
    %9 = arith.extui %8 : i1 to i32
    %c0_i32_4 = arith.constant 0 : i32
    %10 = arith.cmpi ne, %9, %c0_i32_4 : i32
    scf.if %10 {
      %11 = arith.index_cast %arg2 : i32 to index
      %c0 = arith.constant 0 : index
      %c0_5 = arith.constant 0 : index
      %12 = vector.load %arg17[%11, %c0, %c0_5] : memref<1x8x128xf32, #tpu.memory_space<vmem>>, vector<1x8x128xf32>
      %13 = vector.shape_cast %12 : vector<1x8x128xf32> to vector<8x128xf32>
      %c0_6 = arith.constant 0 : index
      %c0_7 = arith.constant 0 : index
      %14 = vector.load %arg18[%c0_6, %c0_7] : memref<8x1xf32, #tpu.memory_space<vmem>>, vector<8x1xf32>
      %15 = vector.broadcast %14 : vector<8x1xf32> to vector<8x128xf32>
      %16 = arith.subf %13, %15 : vector<8x128xf32>
      %17 = math.exp %16 : vector<8x128xf32>
      %c0_8 = arith.constant 0 : index
      %c0_9 = arith.constant 0 : index
      %18 = vector.load %arg19[%c0_8, %c0_9] : memref<8x1xf32, #tpu.memory_space<vmem>>, vector<8x1xf32>
      %19 = vector.broadcast %18 : vector<8x1xf32> to vector<8x128xf32>
      %20 = arith.divf %17, %19 : vector<8x128xf32>
      %c0_10 = arith.constant 0 : index
      %c0_11 = arith.constant 0 : index
      %21 = vector.load %arg14[%c0_10, %c0_11] : memref<8x128xf32, #tpu.memory_space<vmem>>, vector<8x128xf32>
      tpu.vector_store %arg14[%c0_10, %c0_11], %20 {strides = array<i32>} : memref<8x128xf32, #tpu.memory_space<vmem>>, vector<8x128xf32>,
    } else {
    }
    return
  }
  func.func @transform_0(%arg0: i32, %arg1: i32, %arg2: i32) -> (i32, i32) {
    %c0_i32 = arith.constant 0 : i32
    %c0_i32_0 = arith.constant 0 : i32
    return %arg0, %c0_i32 : i32, i32
  }
  func.func @transform_1(%arg0: i32, %arg1: i32, %arg2: i32) -> (i32, i32) {
    %c0_i32 = arith.constant 0 : i32
    %c0_i32_0 = arith.constant 0 : i32
    return %arg0, %c0_i32 : i32, i32
  }
  func.func @transform_2(%arg0: i32, %arg1: i32, %arg2: i32) -> (i32, i32, i32) {
    %c0_i32 = arith.constant 0 : i32
    %c0_i32_0 = arith.constant 0 : i32
    %c0_i32_1 = arith.constant 0 : i32
    return %arg0, %c0_i32, %c0_i32_0 : i32, i32, i32
  }
  func.func @transform_3(%arg0: i32, %arg1: i32, %arg2: i32) -> (i32, i32) {
    %c0_i32 = arith.constant 0 : i32
    %c0_i32_0 = arith.constant 0 : i32
    %c0_i32_1 = arith.constant 0 : i32
    return %c0_i32, %c0_i32_0 : i32, i32
  }
  func.func @transform_4(%arg0: i32, %arg1: i32, %arg2: i32) -> (i32, i32) {
    %c0_i32 = arith.constant 0 : i32
    %c0_i32_0 = arith.constant 0 : i32
    %c0_i32_1 = arith.constant 0 : i32
    return %c0_i32, %c0_i32_0 : i32, i32
  }
  func.func @transform_5(%arg0: i32, %arg1: i32, %arg2: i32) -> (i32, i32) {
    %c0_i32 = arith.constant 0 : i32
    %c0_i32_0 = arith.constant 0 : i32
    %c0_i32_1 = arith.constant 0 : i32
    return %c0_i32, %c0_i32_0 : i32, i32
  }
  func.func @transform_6(%arg0: i32, %arg1: i32, %arg2: i32) -> (i32, i32) {
    %c0_i32 = arith.constant 0 : i32
    %c0_i32_0 = arith.constant 0 : i32
    %c0_i32_1 = arith.constant 0 : i32
    return %c0_i32, %c0_i32_0 : i32, i32
  }
  func.func @transform_7(%arg0: i32, %arg1: i32, %arg2: i32) -> (i32, i32) {
    %c0_i32 = arith.constant 0 : i32
    %c0_i32_0 = arith.constant 0 : i32
    %c0_i32_1 = arith.constant 0 : i32
    return %c0_i32, %c0_i32_0 : i32, i32
  }
  func.func @transform_8(%arg0: i32, %arg1: i32, %arg2: i32) -> (i32, i32) {
    %c0_i32 = arith.constant 0 : i32
    %c0_i32_0 = arith.constant 0 : i32
    %c0_i32_1 = arith.constant 0 : i32
    return %c0_i32, %c0_i32_0 : i32, i32
  }
  func.func @transform_9(%arg0: i32, %arg1: i32, %arg2: i32) -> (i32, i32) {
    %c1_i32 = arith.constant 1 : i32
    %0 = arith.subi %c1_i32, %arg1 : i32
    %1 = arith.muli %arg2, %0 : i32
    %c0_i32 = arith.constant 0 : i32
    %2 = arith.muli %c0_i32, %arg1 : i32
    %3 = arith.addi %1, %2 : i32
    %c0_i32_0 = arith.constant 0 : i32
    %c0_i32_1 = arith.constant 0 : i32
    return %c0_i32_0, %3 : i32, i32
  }
  func.func @transform_10(%arg0: i32, %arg1: i32, %arg2: i32) -> (i32, i32) {
    %c1_i32 = arith.constant 1 : i32
    %0 = arith.subi %c1_i32, %arg1 : i32
    %1 = arith.muli %arg2, %0 : i32
    %c0_i32 = arith.constant 0 : i32
    %2 = arith.muli %c0_i32, %arg1 : i32
    %3 = arith.addi %1, %2 : i32
    %c0_i32_0 = arith.constant 0 : i32
    %c0_i32_1 = arith.constant 0 : i32
    return %c0_i32_0, %3 : i32, i32
  }
  func.func @transform_11(%arg0: i32, %arg1: i32, %arg2: i32) -> (i32, i32) {
    %0 = arith.muli %arg2, %arg1 : i32
    %c0_i32 = arith.constant 0 : i32
    return %arg0, %0 : i32, i32
  }
  func.func @transform_12(%arg0: i32, %arg1: i32, %arg2: i32) -> (i32, i32) {
    %c0_i32 = arith.constant 0 : i32
    %c0_i32_0 = arith.constant 0 : i32
    return %arg0, %c0_i32 : i32, i32
  }
}

</mosaic_0001>

<bundles_post_ra>
// kernel: luong_decoder_forward.1
= control target key start
LH: loop header
LB: loop body
LE: loop exit
PB: predicated region body
PF: predicated region fallthrough
CT: control target
= control target key end

     0   :  { %s3134_s21 = smov 0   ;;  %s3136_s22 = smov 0   ;;  %s3602_s0 = inlined_call_operand.vmem [shape: bf16[8,128], index: 0, kind: input, shape index: {}]   ;;  %s3603_s1 = inlined_call_operand.vmem [shape: f32[8,128], index: 1, kind: input, shape index: {}, may-alias: {1,12}]   ;;  %s3604_s2 = inlined_call_operand.vmem [shape: bf16[8,8,128], index: 2, kind: input, shape index: {}]   ;;  %s3605_s3 = inlined_call_operand.vmem [shape: bf16[128,384], index: 3, kind: input, shape index: {}]   ;;  %s3606_s4 = inlined_call_operand.vmem [shape: bf16[128,384], index: 4, kind: input, shape index: {}]   ;;  %s3607_s5 = inlined_call_operand.vmem [shape: f32[1,384], index: 5, kind: input, shape index: {}]   ;;  %s3608_s6 = inlined_call_operand.vmem [shape: f32[1,384], index: 6, kind: input, shape index: {}]   ;;  %s3609_s7 = inlined_call_operand.vmem [shape: bf16[256,128], index: 7, kind: input, shape index: {}]   ;;  %s3610_s8 = inlined_call_operand.vmem [shape: f32[1,128], index: 8, kind: input, shape index: {}]   ;;  %s3611_s9 = inlined_call_operand.vmem [shape: bf16[128,128], index: 9, kind: input, shape index: {}]   ;;  %s3612_s10 = inlined_call_operand.vmem [shape: f32[1,128], index: 10, kind: input, shape index: {}]   ;;  %s3613_s11 = inlined_call_operand.vmem [shape: f32[8,128], index: 11, kind: output, shape index: {0}]   ;;  %s3614_s12 = inlined_call_operand.vmem [shape: f32[8,128], index: 12, kind: output, shape index: {1}, may-alias: {1,12}]  }
   0x1   :  { %s3138_s23 = smov 0  }
   0x2 LB: > { %s38_s24 = sadd.s32 1, %s3054_s22  ;;  %p2526_p0 = scmp.ge.s32.totalorder %s3058_s23, 1  ;;  %s3058_s23 = sphi %s3138_s23, %s23_s23   ;;  %s3054_s22 = sphi %s3136_s22, %s3616_s22   ;;  %s3050_s21 = sphi %s3134_s21, %s3615_s21  }
   0x3   : > { %p40_p1 = scmp.ge.s32.totalorder %s38_s24, 2  ;;  %p440_p2 = scmp.lt.s32.totalorder %s3058_s23, 3 }
   0x5   : > { %s3618_s24 = smov (%p40_p1, %s38_s24), 0  ;;  %p441_p3 = pnand %p2526_p0, %p440_p2 }
   0x6   : > { %p551_p4 = scmp.eq.s32.totalorder (!%p441_p3), %s3050_s21, 0 }
   0x7   : > { %444 = sbr.rel (%p441_p3) target bundleno = 2114 (0x842), region = 64 }
   0xc   : > { %556 = sbr.rel (!%p551_p4) target bundleno = 1301 (0x515), region = 68  ;;  %v2894_v0 = vld [vmem:[%s3605_s3 + $0xac] ss:$12 sps:$4 sm:$0xff] (%p551_p4)   ;;  %v2896_v1 = vld [vmem:[%s3605_s3 + $0xa8] ss:$12 sps:$4 sm:$0xff] (%p551_p4)   ;;  %v3060_v2 = vmov (%p551_p4), 0.0   ;;  %v593_v63 = vlaneseq (%p551_p4) }
   0xd   : > { %2705 = vmatprep.subr.bf16.mxu1 (%p551_p4), %v3060_v2  ;;  %v3061_v3 = vmov (%p551_p4), 0   ;;  %736 = vmatprep.subr.bf16.mxu0 (%p551_p4), %v2894_v0  ;;  %v2897_v4 = vld [vmem:[%s3605_s3 + $0x94] ss:$12 sps:$4 sm:$0xff] (%p551_p4)   ;;  %vm3062_vm0 = vmmov (%p551_p4), 0   ;;  %v2899_v5 = vld [vmem:[%s3605_s3 + $0x90] ss:$12 sps:$4 sm:$0xff] (%p551_p4)  }
   0xe   : > { %768 = vmatprep.mubr.bf16.mxu0 (%p551_p4), %v3061_v3  ;;  %2721 = vmatprep.mubr.msk.bf16.mxu1 (%p551_p4), %vm3062_vm0, %v3060_v2  ;;  %v2900_v6 = vld [vmem:[%s3605_s3 + $0x7c] ss:$12 sps:$4 sm:$0xff] (%p551_p4)   ;;  %v2902_v7 = vld [vmem:[%s3605_s3 + $0x78] ss:$12 sps:$4 sm:$0xff] (%p551_p4)   ;;  %v2905_v9 = vld [vmem:[%s3605_s3 + $0x60] ss:$12 sps:$4 sm:$0xff] (%p551_p4)  }
   0xf   : > { %737 = vmatpush1.bf16.msra.mxu0 (%p551_p4), %v2896_v1  ;;  %v2903_v8 = vld [vmem:[%s3605_s3 + $0x64] ss:$12 sps:$4 sm:$0xff] (%p551_p4)   ;;  %v2906_v11 = vld [vmem:[%s3605_s3 + $0x4c] ss:$12 sps:$4 sm:$0xff] (%p551_p4)   ;;  %v2908_v13 = vld [vmem:[%s3605_s3 + $0x48] ss:$12 sps:$4 sm:$0xff] (%p551_p4)  }
  0x10   : > { %738 = vmatprep.subr.bf16.mxu0 (%p551_p4), %v2897_v4  ;;  %v2918_v10 = vld [vmem:[%s3605_s3 + $0xb0] ss:$12 sps:$4 sm:$0xff] (%p551_p4)   ;;  %v2922_v12 = vld [vmem:[%s3605_s3 + $0x98] ss:$12 sps:$4 sm:$0xff] (%p551_p4)   ;;  %v2909_v14 = vld [vmem:[%s3605_s3 + $0x34] ss:$12 sps:$4 sm:$0xff] (%p551_p4)  }
  0x11   : > { %2706 = vmatpush3.bf16.msra.mxu1 %v2918_v10  ;;  %v2926_v15 = vld [vmem:[%s3605_s3 + $0x80] ss:$12 sps:$4 sm:$0xff]   ;;  %v2911_v16 = vld [vmem:[%s3605_s3 + $0x30] ss:$12 sps:$4 sm:$0xff]   ;;  %v2930_v18 = vld [vmem:[%s3605_s3 + $0x68] ss:$12 sps:$4 sm:$0xff]  }
  0x12   : > { %2707 = vmatprep.subr.bf16.mxu1 %v3060_v2  ;;  %v2912_v17 = vld [vmem:[%s3605_s3 + $0x1c] ss:$12 sps:$4 sm:$0xff]   ;;  %v2914_v19 = vld [vmem:[%s3605_s3 + $0x18] ss:$12 sps:$4 sm:$0xff]   ;;  %v2917_v22 = vld [vmem:[%s3605_s3] ss:$12 sps:$4 sm:$0xff]  }
  0x13   : > { %739 = vmatpush1.bf16.msra.mxu0 %v2899_v5  ;;  %v2915_v20 = vld [vmem:[%s3605_s3 + $0x4] ss:$12 sps:$4 sm:$0xff]   ;;  %v2921_v23 = vld [vmem:[%s3606_s4 + $0xac] ss:$12 sps:$4 sm:$0xff]   ;;  %v557_v25 = vld [vmem:[%s3602_s0] sm:$0xf] }
  0x14   : > { %740 = vmatprep.subr.bf16.mxu0 %v2900_v6  ;;  %v2934_v21 = vld [vmem:[%s3605_s3 + $0x50] ss:$12 sps:$4 sm:$0xff]   ;;  %v2938_v24 = vld [vmem:[%s3605_s3 + $0x38] ss:$12 sps:$4 sm:$0xff]   ;;  %v2919_v26 = vld [vmem:[%s3606_s4 + $0xa8] ss:$12 sps:$4 sm:$0xff]  }
  0x15   : > { %2708 = vmatpush3.bf16.msra.mxu1 %v2922_v12  ;;  %v2925_v27 = vld [vmem:[%s3606_s4 + $0x94] ss:$12 sps:$4 sm:$0xff]   ;;  %v2923_v29 = vld [vmem:[%s3606_s4 + $0x90] ss:$12 sps:$4 sm:$0xff]   ;;  %v2927_v31 = vld [vmem:[%s3606_s4 + $0x78] ss:$12 sps:$4 sm:$0xff]  }
  0x16   : > { %2709 = vmatprep.subr.bf16.mxu1 %v3060_v2  ;;  %v2942_v28 = vld [vmem:[%s3605_s3 + $0x20] ss:$12 sps:$4 sm:$0xff]   ;;  %v2929_v30 = vld [vmem:[%s3606_s4 + $0x7c] ss:$12 sps:$4 sm:$0xff]   ;;  %v2933_v33 = vld [vmem:[%s3606_s4 + $0x64] ss:$12 sps:$4 sm:$0xff]  }
  0x17   : > { %741 = vmatpush1.bf16.msra.mxu0 %v2902_v7  ;;  %v2946_v32 = vld [vmem:[%s3605_s3 + $0x8] ss:$12 sps:$4 sm:$0xff]   ;;  %v2950_v34 = vld [vmem:[%s3606_s4 + $0xb0] ss:$12 sps:$4 sm:$0xff]   ;;  %v2931_v35 = vld [vmem:[%s3606_s4 + $0x60] ss:$12 sps:$4 sm:$0xff]  }
  0x18   : > { %742 = vmatprep.subr.bf16.mxu0 %v2903_v8  ;;  %v2937_v36 = vld [vmem:[%s3606_s4 + $0x4c] ss:$12 sps:$4 sm:$0xff]   ;;  %v2935_v38 = vld [vmem:[%s3606_s4 + $0x48] ss:$12 sps:$4 sm:$0xff]   ;;  %v2939_v41 = vld [vmem:[%s3606_s4 + $0x30] ss:$12 sps:$4 sm:$0xff]  }
  0x19   : > { %2710 = vmatpush3.bf16.msra.mxu1 %v2926_v15  ;;  %v2951_v37 = vld [vmem:[%s3606_s4 + $0x98] ss:$12 sps:$4 sm:$0xff]   ;;  %v2941_v39 = vld [vmem:[%s3606_s4 + $0x34] ss:$12 sps:$4 sm:$0xff]   ;;  %v2945_v42 = vld [vmem:[%s3606_s4 + $0x1c] ss:$12 sps:$4 sm:$0xff]  }
  0x1a   : > { %2711 = vmatprep.subr.bf16.mxu1 %v3060_v2  ;;  %v2952_v40 = vld [vmem:[%s3606_s4 + $0x80] ss:$12 sps:$4 sm:$0xff]   ;;  %v2953_v43 = vld [vmem:[%s3606_s4 + $0x68] ss:$12 sps:$4 sm:$0xff]   ;;  %v2943_v44 = vld [vmem:[%s3606_s4 + $0x18] ss:$12 sps:$4 sm:$0xff]  }
  0x1b   : > { %743 = vmatpush1.bf16.msra.mxu0 %v2905_v9  ;;  %v2949_v45 = vld [vmem:[%s3606_s4 + $0x4] ss:$12 sps:$4 sm:$0xff]   ;;  %v2947_v47 = vld [vmem:[%s3606_s4] ss:$12 sps:$4 sm:$0xff]   ;;  %v2957_v52 = vld [vmem:[%s3606_s4 + $0x8] ss:$12 sps:$4 sm:$0xff]  }
  0x1c   : > { %744 = vmatprep.subr.bf16.mxu0 %v2906_v11  ;;  %v2954_v46 = vld [vmem:[%s3606_s4 + $0x50] ss:$12 sps:$4 sm:$0xff]   ;;  %v3313_v48 = vld [vmem:[%s3603_s1] sm:$0xff]  ;;  %v594_v0 = vshrl.u32 %v593_v63, 7  ;;  %vm1508_vm1 = vcmask 57344   ;;  %vm1609_vm2 = vcmask 1043456  }
  0x1d   : > { %2712 = vmatpush3.bf16.msra.mxu1 %v2930_v18  ;;  %v2955_v49 = vld [vmem:[%s3606_s4 + $0x38] ss:$12 sps:$4 sm:$0xff]   ;;  %v817_v50 = vpack.c.bf16 %v3313_v48, %v3313_v48  ;;  %v2956_v51 = vld [vmem:[%s3606_s4 + $0x20] ss:$12 sps:$4 sm:$0xff]   ;;  %v3343_v54 = vld [vmem:[%s3604_s2 + $0x10] sm:$0xf] }
  0x1e   : > { %2713 = vmatprep.subr.bf16.mxu1 %v3060_v2  ;;  %v3338_v53 = vld [vmem:[%s3604_s2] sm:$0xf]  ;;  %v3349_v1 = vsub.s32 0, %v594_v0  ;;  %v599_v7 = vsub.s32 1, %v594_v0  ;;  %vm1605_vm3 = vcmask 64512   ;;  %vm1984_vm4 = vcmask 1041409  }
  0x1f   : > { %745 = vmatpush1.bf16.msra.mxu0 %v2908_v13  ;;  %v850_v4 = vld [vmem:[%s3608_s6] sm:$0x7]  ;;  %vm1987_vm5 = vcmask 1042434   ;;  %vm1990_vm6 = vcmask 1043459   ;;  %vm1993_vm7 = vcmask 1044484   ;;  %vm1996_vm8 = vcmask 1045509  }
  0x20   : > { %746 = vmatprep.subr.bf16.mxu0 %v2909_v14  ;;  %v855_v6 = vrot.slane %v850_v4, %v3349_v1  ;;  %v859_v11 = vrot.slane %v850_v4, %v599_v7  ;;  %vm1999_vm9 = vcmask 1046534   ;;  %vm2002_vm10 = vcmask 1047559  }
  0x21   : > { %2714 = vmatpush3.bf16.msra.mxu1 %v2934_v21  ;;  %vm2184_vm11 = vcmask 7168  }
  0x22   : > { %2715 = vmatprep.subr.bf16.mxu1 %v3060_v2  ;;  %2186 = vst.msk [vmem:[#allocation5] sm:$0xff] %vm2184_vm11, %v3060_v2 }
  0x23   : > { %747 = vmatpush1.bf16.msra.mxu0 %v2911_v16 }
  0x24   : > { %748 = vmatprep.subr.bf16.mxu0 %v2912_v17 }
  0x25   : > { %2716 = vmatpush3.bf16.msra.mxu1 %v2938_v24 }
  0x26   : > { %2717 = vmatprep.subr.bf16.mxu1 %v3060_v2 }
  0x27   : > { %749 = vmatpush1.bf16.msra.mxu0 %v2914_v19 }
  0x28   : > { %750 = vmatprep.subr.bf16.mxu0 %v2915_v20 }
  0x29   : > { %2718 = vmatpush3.bf16.msra.mxu1 %v2942_v28  ;;  %v603_v28 = vsub.s32 2, %v594_v0 }
  0x2a   : > { %2719 = vmatprep.subr.bf16.mxu1 %v3060_v2 }
  0x2b   : > { %751 = vmatpush1.bf16.msra.mxu0 %v2917_v22 }
  0x2c   : > { %995 = vmatprep.subr.bf16.mxu0 %v2921_v23 }
  0x2d   : > { %2720 = vmatpush3.bf16.msra.mxu1 %v2946_v32 }
  0x2e   : > { %769 = vmatmul.mubr.bf16.vlgmr.msra.gmra.mxu0 %v557_v25  ;;  %2725 = vmatprep.subr.bf16.mxu1 %v3060_v2 }
  0x2f   : > { %996 = vmatpush1.bf16.msra.mxu0 %v2919_v26  ;;  %1027 = vmatprep.mubr.bf16.mxu0 %v3061_v3  ;;  %v591_v3 = vld [vmem:[%s3607_s5] sm:$0x7] }
  0x30   : > { %997 = vmatprep.subr.bf16.mxu0 %v2925_v27  ;;  %2722 = vmatmul.mubr.bf16.vlgmr.msra.gmra.mxu1 %v557_v25  ;;  %v596_v5 = vrot.slane %v591_v3, %v3349_v1  ;;  %v600_v13 = vrot.slane %v591_v3, %v599_v7 }
  0x31   : > { %2726 = vmatpush3.bf16.msra.mxu1 %v2950_v34  ;;  %2741 = vmatprep.mubr.msk.bf16.mxu1 %vm3062_vm0, %v3060_v2 }
  0x32   : > { %2727 = vmatprep.subr.bf16.mxu1 %v3060_v2 }
  0x33   : > { %998 = vmatpush1.bf16.msra.mxu0 %v2923_v29  ;;  %v863_v29 = vrot.slane %v850_v4, %v603_v28 }
  0x34   : > { %999 = vmatprep.subr.bf16.mxu0 %v2929_v30 }
  0x35   : > { %2728 = vmatpush3.bf16.msra.mxu1 %v2951_v37 }
  0x36   : > { %2729 = vmatprep.subr.bf16.mxu1 %v3060_v2 }
  0x37   : > { %1000 = vmatpush1.bf16.msra.mxu0 %v2927_v31  ;;  %v604_v31 = vrot.slane %v591_v3, %v603_v28 }
  0x38   : > { %1001 = vmatprep.subr.bf16.mxu0 %v2933_v33 }
  0x39   : > { %2730 = vmatpush3.bf16.msra.mxu1 %v2952_v40 }
  0x3a   : > { %2731 = vmatprep.subr.bf16.mxu1 %v3060_v2 }
  0x3b   : > { %1002 = vmatpush1.bf16.msra.mxu0 %v2931_v35 }
  0x3c   : > { %1003 = vmatprep.subr.bf16.mxu0 %v2937_v36 }
  0x3d   : > { %2732 = vmatpush3.bf16.msra.mxu1 %v2953_v43 }
  0x3e   : > { %2733 = vmatprep.subr.bf16.mxu1 %v3060_v2 }
  0x3f   : > { %1004 = vmatpush1.bf16.msra.mxu0 %v2935_v38  ;;  %v3063_v38 = vmov 1966171168  }
  0x40   : > { %1005 = vmatprep.subr.bf16.mxu0 %v2941_v39  ;;  %v1109_v39 = vunpack.c.l.s4 %v3063_v38 }
  0x41   : > { %2734 = vmatpush3.bf16.msra.mxu1 %v2954_v46 }
  0x42   : > { %2735 = vmatprep.subr.bf16.mxu1 %v3060_v2 }
  0x43   : > { %1006 = vmatpush1.bf16.msra.mxu0 %v2939_v41 }
  0x44   : > { %1007 = vmatprep.subr.bf16.mxu0 %v2945_v42  ;;  %v1110_v42 = vunpack.c.0.s8 %v1109_v39 }
  0x45   : > { %2736 = vmatpush3.bf16.msra.mxu1 %v2955_v49 }
  0x46   : > { %2737 = vmatprep.subr.bf16.mxu1 %v3060_v2 }
  0x47   : > { %1008 = vmatpush1.bf16.msra.mxu0 %v2943_v44 }
  0x48   : > { %1009 = vmatprep.subr.bf16.mxu0 %v2949_v45 }
  0x49   : > { %2738 = vmatpush3.bf16.msra.mxu1 %v2956_v51 }
  0x4a   : > { %2739 = vmatprep.subr.bf16.mxu1 %v3060_v2 }
  0x4b   : > { %1010 = vmatpush1.bf16.msra.mxu0 %v2947_v47  ;;  %v1113_v47 = vsub.s32 %v1110_v42, %v594_v0 }
  0x4c   : > { %2769 = vmatprep.subr.bf16.mxu0 %v3060_v2 }
  0x4d   : > { %2740 = vmatpush3.bf16.msra.mxu1 %v2957_v52 }
  0x4e   : > { %1028 = vmatmul.mubr.bf16.vlgmr.msra.gmra.mxu0 %v817_v50  ;;  %2745 = vmatprep.subr.bf16.mxu1 %v3060_v2 }
  0x4f   : > { %2771 = vmatprep.mubr.msk.bf16.mxu0 %vm3062_vm0, %v3060_v2  ;;  %2770 = vmatpush3.bf16.xpose.msra.mxu0 %v3343_v54 }
  0x50   : > { %2742 = vmatmul.mubr.bf16.vlgmr.msra.gmra.mxu1 %v817_v50  ;;  %2781 = vmatprep.subr.bf16.mxu0 %v3060_v2 }
  0x51   : > { %2747 = vmatprep.mubr.msk.bf16.mxu1 %vm3062_vm0, %v3060_v2  ;;  %2746 = vmatpush3.bf16.xpose.msra.mxu1 %v3338_v53 }
  0x52   : > { %2751 = vmatprep.subr.bf16.mxu1 %v3060_v2 }
  0xee   : > { %v770_v55 = vpop.f32.mrf.mxu0 }
  0xef   : > { %v771_v9 = vadd.f32 %v770_v55, %v596_v5  ;;  %v3390_v5 = vld [vmem:[%s3604_s2 + $0x8] sm:$0xf] }
  0xf0   : > { %v772_v56 = vpop.f32.mrf.mxu0  ;;  %v811_v59 = vpop.f32.mrf.mxu1 }
  0xf1   : > { %v773_v19 = vadd.f32 %v772_v56, %v600_v13  ;;  %v812_v35 = vadd.f32 %v811_v59, %v604_v31  ;;  %v3413_v13 = vld [vmem:[%s3604_s2 + $0x14] sm:$0xf] }
  0xf2   : > { %v774_v57 = vpop.f32.mrf.mxu0  ;;  %v2723_v60 = vpop.f32.mrf.mxu1 }
  0xf4   : > { %v775_v58 = vpop.f32.mrf.mxu0  ;;  %v814_v61 = vpop.f32.mrf.mxu1 }
  0xf6   : > { %v2724_v62 = vpop.f32.mrf.mxu1 }
  0xf7   : > { %v3376_v62 = vld [vmem:[%s3604_s2 + $0x18] sm:$0xf] }
 0x10e   : > { %v1029_v8 = vpop.f32.mrf.mxu0 }
 0x10f   : > { %v1030_v10 = vadd.f32 %v1029_v8, %v855_v6 }
 0x110   : > { %v1031_v12 = vpop.f32.mrf.mxu0  ;;  %v1070_v21 = vpop.f32.mrf.mxu1 }
 0x111   : > { %v1076_v14 = vadd.f32 %v1030_v10, %v771_v9  ;;  %v1032_v17 = vadd.f32 %v1031_v12, %v859_v11  ;;  %v1071_v33 = vadd.f32 %v1070_v21, %v863_v29  ;;  %v3403_v9 = vld [vmem:[%s3604_s2 + $0xc] sm:$0xf] }
 0x112   : > { %v1033_v15 = vpop.f32.mrf.mxu0  ;;  %v2743_v22 = vpop.f32.mrf.mxu1 }
 0x113   : > { %v2576_v16 = vmul.f32 -1.442695, %v1076_v14  ;;  %v1083_v20 = vadd.f32 %v1032_v17, %v773_v19  ;;  %v3423_v17 = vld [vmem:[%s3604_s2 + $0x1c] sm:$0xf] }
 0x114   : > { %v1034_v18 = vpop.f32.mrf.mxu0  ;;  %v1073_v24 = vpop.f32.mrf.mxu1 }
 0x115   : > { %2974 = vpow2.f32 %v2576_v16  ;;  %v2577_v23 = vmul.f32 -1.442695, %v1083_v20 }
 0x116   : > { %v2744_v25 = vpop.f32.mrf.mxu1 }
 0x117   : > { %2976 = vpow2.f32 %v2577_v23 }
 0x122   : > { %v2975_v26 = vpop.eup %2974 }
 0x123   : > { %v1080_v27 = vadd.f32 1.0, %v2975_v26 }
 0x124   : > { %v2977_v30 = vpop.eup %2976 }
 0x125   : > { %2978 = vrcp.f32 %v1080_v27  ;;  %v1087_v32 = vadd.f32 1.0, %v2977_v30 }
 0x127   : > { %2980 = vrcp.f32 %v1087_v32 }
 0x132   : > { %v2979_v34 = vpop.eup %2978 }
 0x133   : > { %v1090_v36 = vmul.f32 %v2979_v34, %v1071_v33 }
 0x134   : > { %v2981_v40 = vpop.eup %2980 }
 0x135   : > { %v1091_v37 = vadd.f32 %v1090_v36, %v812_v35  ;;  %v1093_v41 = vsub.f32 1.0, %v2981_v40  ;;  %v1095_v44 = vmul.f32 %v2981_v40, %v3313_v48  ;;  %v3370_v48 = vld [vmem:[%s3604_s2 + $0x4] sm:$0xf] }
 0x137   : > { %2982 = vtanh.f32 %v1091_v37 }
 0x144   : > { %v2983_v43 = vpop.eup %2982 }
 0x145   : > { %v1094_v45 = vmul.f32 %v2983_v43, %v1093_v41 }
 0x147   : > { %v1096_v46 = vadd.f32 %v1095_v44, %v1094_v45 }
 0x149   : > { %1097 = vst [vmem:[%s3614_s12] sm:$0xff] %v1096_v46  ;;  %v3363_v49 = vpack.c.bf16 %v1096_v46, %v1096_v46 }
 0x14b   : > { %v1114_v50 = vrot.slane %v3363_v49, %v1113_v47 }
 0x14d   : > { %v1122_v51 = vrot.slane %v1114_v50, %v1113_v47  ;;  %v1115_v52 = vcombine.high %v1114_v50, %v1114_v50 }
 0x14f   : > { %v2578_v55 = vpack.i.b16 %v1122_v51, %v1122_v51  ;;  %v1130_v56 = vcombine.high %v1122_v51, %v1122_v51  ;;  %v1129_v57 = vrot.slane %v1115_v52, %v1113_v47  ;;  %v1133_v60 = vunpack.i.h.s16 %v1122_v51 }
 0x151   : > { %v1144_v58 = vrot.slane %v2578_v55, %v3349_v1  ;;  %v2580_v59 = vpack.i.b16 %v1130_v56, %v1130_v56  ;;  %v1131_v63 = vcombine.high %v1129_v57, %v1129_v57  ;;  %v1186_v0 = vpack.i.b16 %v1133_v60, %v1133_v60 }
 0x152   : > { %v2579_v7 = vpack.i.b16 %v1129_v57, %v1129_v57  ;;  %v1135_v10 = vunpack.i.h.s16 %v1129_v57  ;;  %v1137_v14 = vunpack.i.h.s16 %v1130_v56 }
 0x153   : > { %2748 = vmatmul.mubr.bf16.vlgmr.msra.gmra.mxu1 %v1144_v58  ;;  %v1328_v61 = vrot.slane %v2580_v59, %v3349_v1  ;;  %v2581_v3 = vpack.i.b16 %v1131_v63, %v1131_v63  ;;  %v1190_v4 = vrot.slane %v1186_v0, %v3349_v1  ;;  %v1139_v18 = vunpack.i.h.s16 %v1131_v63 }
 0x154   : > { %2752 = vmatpush3.bf16.xpose.msra.mxu1 %v3370_v48  ;;  %2753 = vmatprep.mubr.msk.bf16.mxu1 %vm3062_vm0, %v3060_v2  ;;  %v1236_v8 = vrot.slane %v2579_v7, %v3349_v1  ;;  %v1278_v11 = vpack.i.b16 %v1135_v10, %v1135_v10  ;;  %v1370_v15 = vpack.i.b16 %v1137_v14, %v1137_v14 }
 0x155   : > { %2772 = vmatmul.mubr.bf16.vlgmr.msra.gmra.mxu0 %v1328_v61  ;;  %2757 = vmatprep.subr.bf16.mxu1 %v3060_v2  ;;  %v1420_v6 = vrot.slane %v2581_v3, %v3349_v1  ;;  %v1462_v19 = vpack.i.b16 %v1139_v18, %v1139_v18 }
 0x156   : > { %2782 = vmatpush3.bf16.xpose.msra.mxu0 %v3376_v62  ;;  %2783 = vmatprep.mubr.msk.bf16.mxu0 %vm3062_vm0, %v3060_v2  ;;  %v1282_v12 = vrot.slane %v1278_v11, %v3349_v1  ;;  %v1374_v16 = vrot.slane %v1370_v15, %v3349_v1 }
 0x157   : > { %2793 = vmatprep.subr.bf16.mxu0 %v3060_v2  ;;  %v1466_v20 = vrot.slane %v1462_v19, %v3349_v1 }
 0x15b   : > { %2754 = vmatmul.mubr.bf16.vlgmr.msra.gmra.mxu1 %v1190_v4 }
 0x15c   : > { %2758 = vmatpush3.bf16.xpose.msra.mxu1 %v3390_v5  ;;  %2759 = vmatprep.mubr.msk.bf16.mxu1 %vm3062_vm0, %v3060_v2 }
 0x15d   : > { %2784 = vmatmul.mubr.bf16.vlgmr.msra.gmra.mxu0 %v1420_v6  ;;  %2763 = vmatprep.subr.bf16.mxu1 %v3060_v2 }
 0x15e   : > { %2795 = vmatprep.mubr.msk.bf16.mxu0 %vm3062_vm0, %v3060_v2 }
 0x163   : > { %2760 = vmatmul.mubr.bf16.vlgmr.msra.gmra.mxu1 %v1236_v8 }
 0x164   : > { %2764 = vmatpush3.bf16.xpose.msra.mxu1 %v3403_v9  ;;  %2765 = vmatprep.mubr.msk.bf16.mxu1 %vm3062_vm0, %v3060_v2 }
 0x165   : > { %2775 = vmatprep.subr.bf16.mxu1 %v3060_v2 }
 0x16b   : > { %2766 = vmatmul.mubr.bf16.vlgmr.msra.gmra.mxu1 %v1282_v12 }
 0x16c   : > { %2776 = vmatpush3.bf16.xpose.msra.mxu1 %v3413_v13  ;;  %2777 = vmatprep.mubr.msk.bf16.mxu1 %vm3062_vm0, %v3060_v2 }
 0x16d   : > { %2787 = vmatprep.subr.bf16.mxu1 %v3060_v2 }
 0x173   : > { %2778 = vmatmul.mubr.bf16.vlgmr.msra.gmra.mxu1 %v1374_v16 }
 0x174   : > { %2788 = vmatpush3.bf16.xpose.msra.mxu1 %v3423_v17  ;;  %2789 = vmatprep.mubr.msk.bf16.mxu1 %vm3062_vm0, %v3060_v2 }
 0x175   : > { %2799 = vmatprep.subr.bf16.mxu1 %v3060_v2 }
 0x17b   : > { %2790 = vmatmul.mubr.bf16.vlgmr.msra.gmra.mxu1 %v1466_v20 }
 0x17c   : > { %2801 = vmatprep.mubr.msk.bf16.mxu1 %vm3062_vm0, %v3060_v2 }
 0x213   : > { %v1180_v21 = vpop.f32.mrf.mxu1 }
 0x214   : > { %v1509_v22 = vsel %vm1508_vm1, %v1180_v21, -inf }
 0x215   : > { %1510 = vmax.xlane.f32.xlu0 %v1509_v22  ;;  %v2749_v23 = vpop.f32.mrf.mxu1  ;;  %v1364_v24 = vpop.f32.mrf.mxu0 }
 0x216   : > { %v1521_v35 = vsel %vm1508_vm1, %v1364_v24, -inf }
 0x217   : > { %v1183_v25 = vpop.f32.mrf.mxu1  ;;  %v2773_v26 = vpop.f32.mrf.mxu0 }
 0x219   : > { %v2750_v27 = vpop.f32.mrf.mxu1  ;;  %v1367_v28 = vpop.f32.mrf.mxu0 }
 0x21b   : > { %v1226_v29 = vpop.f32.mrf.mxu1  ;;  %v2774_v30 = vpop.f32.mrf.mxu0 }
 0x21c   : > { %v1512_v31 = vsel %vm1508_vm1, %v1226_v29, -inf }
 0x21d   : > { %1513 = vmax.xlane.f32.xlu0 %v1512_v31  ;;  %v2755_v1 = vpop.f32.mrf.mxu1  ;;  %v1456_v32 = vpop.f32.mrf.mxu0 }
 0x21e   : > { %v1527_v41 = vsel %vm1508_vm1, %v1456_v32, -inf }
 0x21f   : > { %v1229_v33 = vpop.f32.mrf.mxu1  ;;  %v2785_v34 = vpop.f32.mrf.mxu0 }
 0x221   : > { %v2756_v36 = vpop.f32.mrf.mxu1  ;;  %1522 = vmax.xlane.f32.xlu0 %v1521_v35  ;;  %v1459_v37 = vpop.f32.mrf.mxu0  ;;  %v1611_v35 = vsel %vm1609_vm2, %v3338_v53, 0 }
 0x222   : > { %2794 = vmatpush3.bf16.msra.mxu0 %v1611_v35  ;;  %v2969_v35 = vld [vmem:[%s3609_s7 + $0x10] sm:$0xff]  }
 0x223   : > { %v1272_v38 = vpop.f32.mrf.mxu1  ;;  %v2786_v39 = vpop.f32.mrf.mxu0  ;;  %2805 = vmatprep.subr.bf16.mxu0 %v3060_v2 }
 0x224   : > { %v1515_v40 = vsel %vm1508_vm1, %v1272_v38, -inf }
 0x225   : > { %1516 = vmax.xlane.f32.xlu1 %v1515_v40  ;;  %v2761_v42 = vpop.f32.mrf.mxu1  ;;  %1528 = vmax.xlane.f32.xlu0 %v1527_v41 }
 0x227   : > { %v1275_v43 = vpop.f32.mrf.mxu1 }
 0x229   : > { %v2762_v44 = vpop.f32.mrf.mxu1 }
 0x22a   : > { %v1657_v44 = vsel %vm1609_vm2, %v3370_v48, 0  ;;  %v1703_v48 = vsel %vm1609_vm2, %v3390_v5, 0 }
 0x22b   : > { %v1318_v45 = vpop.f32.mrf.mxu1  ;;  %2800 = vmatpush3.bf16.msra.mxu1 %v1657_v44 }
 0x22c   : > { %v1518_v46 = vsel %vm1508_vm1, %v1318_v45, -inf  ;;  %2811 = vmatprep.subr.bf16.mxu1 %v3060_v2 }
 0x22d   : > { %1519 = vmax.xlane.f32.xlu1 %v1518_v46  ;;  %v2767_v47 = vpop.f32.mrf.mxu1 }
 0x22f   : > { %v1321_v50 = vpop.f32.mrf.mxu1 }
 0x231   : > { %v2768_v51 = vpop.f32.mrf.mxu1 }
 0x233   : > { %v1410_v52 = vpop.f32.mrf.mxu1 }
 0x234   : > { %v1524_v55 = vsel %vm1508_vm1, %v1410_v52, -inf }
 0x235   : > { %1525 = vmax.xlane.f32.xlu1 %v1524_v55  ;;  %v2779_v56 = vpop.f32.mrf.mxu1 }
 0x237   : > { %v1413_v57 = vpop.f32.mrf.mxu1 }
 0x239   : > { %v2780_v58 = vpop.f32.mrf.mxu1 }
 0x23b   : > { %v1502_v59 = vpop.f32.mrf.mxu1 }
 0x23c   : > { %v1530_v60 = vsel %vm1508_vm1, %v1502_v59, -inf }
 0x23d   : > { %1531 = vmax.xlane.f32.xlu1 %v1530_v60  ;;  %v2791_v61 = vpop.f32.mrf.mxu1 }
 0x23f   : > { %v1505_v63 = vpop.f32.mrf.mxu1 }
 0x240   : > { %v1749_v63 = vsel %vm1609_vm2, %v3403_v9, 0 }
 0x241   : > { %v2792_v0 = vpop.f32.mrf.mxu1 }
 0x29e   : > { %v1511_v3 = vpop.xlane.xlu0 %1510 }
 0x29f   : > { %v1533_v4 = vsub.f32 %v1180_v21, %v1511_v3 }
 0x2a1   : > { %v1541_v6 = vmul.f32 1.442695, %v1533_v4 }
 0x2a3   : > { %2984 = vpow2.f32 %v1541_v6 }
 0x2a6   : > { %v1514_v7 = vpop.xlane.xlu0 %1513 }
 0x2a7   : > { %v1534_v8 = vsub.f32 %v1226_v29, %v1514_v7  ;;  %v1795_v7 = vsel %vm1609_vm2, %v3343_v54, 0 }
 0x2a9   : > { %v1543_v10 = vmul.f32 1.442695, %v1534_v8 }
 0x2aa   : > { %v1523_v11 = vpop.xlane.xlu0 %1522 }
 0x2ab   : > { %2986 = vpow2.f32 %v1543_v10  ;;  %v1537_v12 = vsub.f32 %v1364_v24, %v1523_v11 }
 0x2ad   : > { %v1549_v19 = vmul.f32 1.442695, %v1537_v12 }
 0x2ae   : > { %v1517_v14 = vpop.xlane.xlu1 %1516  ;;  %v1529_v15 = vpop.xlane.xlu0 %1528 }
 0x2af   : > { %v1535_v16 = vsub.f32 %v1272_v38, %v1517_v14  ;;  %v1539_v22 = vsub.f32 %v1456_v32, %v1529_v15  ;;  %v1887_v15 = vsel %vm1609_vm2, %v3376_v62, 0 }
 0x2b0   : > { %v2985_v18 = vpop.eup %2984 }
 0x2b1   : > { %v1545_v20 = vmul.f32 1.442695, %v1535_v16  ;;  %v1557_v23 = vsel %vm1508_vm1, %v2985_v18, 0.0  ;;  %v1553_v21 = vmul.f32 1.442695, %v1539_v22 }
 0x2b2   : > { %1558 = vadd.xlane.f32.xlu0 %v1557_v23  ;;  %v1933_v23 = vsel %vm1609_vm2, %v3423_v17, 0  ;;  %v2959_v17 = vld [vmem:[%s3609_s7 + $0x38] sm:$0xff]  }
 0x2b3   : > { %2988 = vpow2.f32 %v1545_v20 }
 0x2b4   : > { %2990 = vpow2.f32 %v1549_v19 }
 0x2b5   : > { %2992 = vpow2.f32 %v1553_v21 }
 0x2b6   : > { %v1520_v25 = vpop.xlane.xlu1 %1519 }
 0x2b7   : > { %v1536_v26 = vsub.f32 %v1318_v45, %v1520_v25 }
 0x2b8   : > { %v2987_v27 = vpop.eup %2986 }
 0x2b9   : > { %v1547_v28 = vmul.f32 1.442695, %v1536_v26  ;;  %v1560_v24 = vsel %vm1508_vm1, %v2987_v27, 0.0 }
 0x2ba   : > { %1561 = vadd.xlane.f32.xlu1 %v1560_v24  ;;  %v2961_v24 = vld [vmem:[%s3609_s7 + $0x30] sm:$0xff]  }
 0x2bb   : > { %2994 = vpow2.f32 %v1547_v28  ;;  %v2960_v28 = vld [vmem:[%s3609_s7 + $0x70] sm:$0xff]  }
 0x2be   : > { %v1526_v29 = vpop.xlane.xlu1 %1525 }
 0x2bf   : > { %v1538_v30 = vsub.f32 %v1410_v52, %v1526_v29  ;;  %v2962_v29 = vld [vmem:[%s3609_s7 + $0x68] sm:$0xff]  }
 0x2c0   : > { %v2989_v31 = vpop.eup %2988 }
 0x2c1   : > { %v1551_v1 = vmul.f32 1.442695, %v1538_v30  ;;  %v1563_v32 = vsel %vm1508_vm1, %v2989_v31, 0.0  ;;  %v3443_v33 = vpop.eup %2990  ;;  %v2963_v30 = vld [vmem:[%s3609_s7 + $0x28] sm:$0xff]  }
 0x2c2   : > { %1564 = vadd.xlane.f32.xlu0 %v1563_v32  ;;  %v1569_v34 = vsel %vm1508_vm1, %v3443_v33, 0.0  ;;  %v3449_v36 = vpop.eup %2992  ;;  %v2966_v32 = vld [vmem:[%s3609_s7 + $0x58] sm:$0xff]  }
 0x2c3   : > { %2996 = vpow2.f32 %v1551_v1  ;;  %v1575_v41 = vsel %vm1508_vm1, %v3449_v36, 0.0  ;;  %v2965_v1 = vld [vmem:[%s3609_s7 + $0x20] sm:$0xff]  }
 0x2c6   : > { %1570 = vadd.xlane.f32.xlu0 %v1569_v34  ;;  %v1532_v37 = vpop.xlane.xlu1 %1531  ;;  %v2968_v34 = vld [vmem:[%s3609_s7 + $0x50] sm:$0xff]  }
 0x2c7   : > { %v1540_v38 = vsub.f32 %v1502_v59, %v1532_v37  ;;  %v2971_v37 = vld [vmem:[%s3609_s7 + $0x8] sm:$0xff]  }
 0x2c8   : > { %v2995_v39 = vpop.eup %2994 }
 0x2c9   : > { %v1555_v40 = vmul.f32 1.442695, %v1540_v38  ;;  %v1566_v42 = vsel %vm1508_vm1, %v2995_v39, 0.0  ;;  %v2972_v38 = vld [vmem:[%s3609_s7 + $0x40] sm:$0xff]  }
 0x2ca   : > { %1576 = vadd.xlane.f32.xlu0 %v1575_v41  ;;  %1567 = vadd.xlane.f32.xlu1 %v1566_v42 }
 0x2cb   : > { %2998 = vpow2.f32 %v1555_v40 }
 0x2d0   : > { %v3455_v43 = vpop.eup %2996 }
 0x2d1   : > { %v1572_v53 = vsel %vm1508_vm1, %v3455_v43, 0.0 }
 0x2d2   : > { %1573 = vadd.xlane.f32.xlu1 %v1572_v53 }
 0x2d8   : > { %v3462_v45 = vpop.eup %2998 }
 0x2d9   : > { %v1578_v46 = vsel %vm1508_vm1, %v3462_v45, 0.0 }
 0x2da   : > { %1579 = vadd.xlane.f32.xlu1 %v1578_v46 }
 0x33b   : > { %v1559_v47 = vpop.xlane.xlu0 %1558 }
 0x33c   : > { %3000 = vrcp.f32 %v1559_v47 }
 0x343   : > { %v1562_v50 = vpop.xlane.xlu1 %1561 }
 0x344   : > { %3002 = vrcp.f32 %v1562_v50 }
 0x349   : > { %v3001_v51 = vpop.eup %3000 }
 0x34a   : > { %v1589_v52 = vmul.f32 %v3001_v51, %v2985_v18  ;;  %v1841_v18 = vsel %vm1609_vm2, %v3413_v13, 0 }
 0x34b   : > { %v1565_v55 = vpop.xlane.xlu0 %1564 }
 0x34c   : > { %3004 = vrcp.f32 %v1565_v55  ;;  %v1597_v56 = vpack.c.bf16 %v1589_v52, %v1589_v52 }
 0x34e   : > { %2796 = vmatmul.mubr.msk.bf16.vlgmr.msra.gmra.mxu0 %vm1605_vm3, %v1597_v56 }
 0x34f   : > { %v1571_v57 = vpop.xlane.xlu0 %1570  ;;  %2806 = vmatpush3.bf16.msra.mxu0 %v1703_v48  ;;  %2807 = vmatprep.mubr.msk.bf16.mxu0 %vm3062_vm0, %v3060_v2 }
 0x350   : > { %3006 = vrcp.f32 %v1571_v57  ;;  %2817 = vmatprep.subr.bf16.mxu0 %v3060_v2 }
 0x351   : > { %v3003_v58 = vpop.eup %3002 }
 0x352   : > { %v1590_v59 = vmul.f32 %v3003_v58, %v2987_v27  ;;  %v2958_v27 = vld [vmem:[%s3609_s7 + $0x78] sm:$0xff]  }
 0x353   : > { %v1568_v60 = vpop.xlane.xlu1 %1567  ;;  %v1577_v0 = vpop.xlane.xlu0 %1576 }
 0x354   : > { %v1598_v61 = vpack.c.bf16 %v1590_v59, %v1590_v59  ;;  %3008 = vrcp.f32 %v1568_v60 }
 0x355   : > { %3010 = vrcp.f32 %v1577_v0 }
 0x356   : > { %2802 = vmatmul.mubr.msk.bf16.vlgmr.msra.gmra.mxu1 %vm1605_vm3, %v1598_v61 }
 0x357   : > { %2812 = vmatpush3.bf16.msra.mxu1 %v1749_v63  ;;  %2813 = vmatprep.mubr.msk.bf16.mxu1 %vm3062_vm0, %v3060_v2 }
 0x358   : > { %2823 = vmatprep.subr.bf16.mxu1 %v3060_v2 }
 0x359   : > { %v3005_v5 = vpop.eup %3004 }
 0x35a   : > { %v1591_v3 = vmul.f32 %v3005_v5, %v2989_v31  ;;  %v2964_v31 = vld [vmem:[%s3609_s7 + $0x60] sm:$0xff]  }
 0x35b   : > { %v1574_v4 = vpop.xlane.xlu1 %1573 }
 0x35c   : > { %3012 = vrcp.f32 %v1574_v4  ;;  %v1599_v6 = vpack.c.bf16 %v1591_v3, %v1591_v3 }
 0x35d   : > { %v3007_v9 = vpop.eup %3006 }
 0x35e   : > { %2808 = vmatmul.mubr.msk.bf16.vlgmr.msra.gmra.mxu0 %vm1605_vm3, %v1599_v6  ;;  %v1593_v8 = vmul.f32 %v3007_v9, %v3443_v33  ;;  %v2967_v33 = vld [vmem:[%s3609_s7 + $0x18] sm:$0xff]  }
 0x35f   : > { %2818 = vmatpush3.bf16.msra.mxu0 %v1795_v7  ;;  %2819 = vmatprep.mubr.msk.bf16.mxu0 %vm3062_vm0, %v3060_v2 }
 0x360   : > { %2829 = vmatprep.subr.bf16.mxu0 %v3060_v2  ;;  %v1601_v14 = vpack.c.bf16 %v1593_v8, %v1593_v8 }
 0x361   : > { %v3009_v10 = vpop.eup %3008 }
 0x362   : > { %v1592_v12 = vmul.f32 %v3009_v10, %v2995_v39  ;;  %v3011_v54 = vpop.eup %3010  ;;  %v2973_v39 = vld [vmem:[%s3609_s7] sm:$0xff]  }
 0x363   : > { %v1580_v11 = vpop.xlane.xlu1 %1579  ;;  %v1595_v19 = vmul.f32 %v3011_v54, %v3449_v36  ;;  %v2970_v36 = vld [vmem:[%s3609_s7 + $0x48] sm:$0xff]  }
 0x364   : > { %3014 = vrcp.f32 %v1580_v11  ;;  %v1600_v16 = vpack.c.bf16 %v1592_v12, %v1592_v12 }
 0x365   : > { %v1603_v22 = vpack.c.bf16 %v1595_v19, %v1595_v19 }
 0x366   : > { %2820 = vmatmul.mubr.msk.bf16.vlgmr.msra.gmra.mxu0 %vm1605_vm3, %v1601_v14  ;;  %2814 = vmatmul.mubr.msk.bf16.vlgmr.msra.gmra.mxu1 %vm1605_vm3, %v1600_v16 }
 0x367   : > { %2830 = vmatpush3.bf16.msra.mxu0 %v1887_v15  ;;  %2824 = vmatpush3.bf16.msra.mxu1 %v1841_v18 }
 0x368   : > { %2825 = vmatprep.mubr.msk.bf16.mxu1 %vm3062_vm0, %v3060_v2  ;;  %2831 = vmatprep.mubr.msk.bf16.mxu0 %vm3062_vm0, %v3060_v2 }
 0x369   : > { %v3013_v20 = vpop.eup %3012  ;;  %2835 = vmatprep.subr.bf16.mxu1 %v3060_v2  ;;  %2674 = vmatprep.subr.bf16.mxu0 %v2958_v27 }
 0x36a   : > { %v1594_v62 = vmul.f32 %v3013_v20, %v3455_v43 }
 0x36c   : > { %v1602_v13 = vpack.c.bf16 %v1594_v62, %v1594_v62 }
 0x36e   : > { %2832 = vmatmul.mubr.msk.bf16.vlgmr.msra.gmra.mxu0 %vm1605_vm3, %v1603_v22  ;;  %2826 = vmatmul.mubr.msk.bf16.vlgmr.msra.gmra.mxu1 %vm1605_vm3, %v1602_v13 }
 0x36f   : > { %2836 = vmatpush3.bf16.msra.mxu1 %v1933_v23  ;;  %2837 = vmatprep.mubr.msk.bf16.mxu1 %vm3062_vm0, %v3060_v2 }
 0x370   : > { %2675 = vmatpush3.bf16.msra.mxu0 %v2959_v17  ;;  %v3064_v17 = vmov -1e+30  }
 0x371   : > { %v3015_v21 = vpop.eup %3014  ;;  %2676 = vmatprep.subr.bf16.mxu0 %v2960_v28  ;;  %2185 = vst.msk [vmem:[#allocation4] sm:$0xff] %vm2184_vm11, %v3064_v17 }
 0x372   : > { %v1596_v25 = vmul.f32 %v3015_v21, %v3462_v45 }
 0x374   : > { %v1604_v26 = vpack.c.bf16 %v1596_v25, %v1596_v25  ;;  %2677 = vmatpush3.bf16.msra.mxu0 %v2961_v24  ;;  %v2590_v24 = vld [vmem:[%s3610_s8] ss:$0 sm:$0xff] }
 0x375   : > { %2678 = vmatprep.subr.bf16.mxu0 %v2962_v29 }
 0x376   : > { %2838 = vmatmul.mubr.msk.bf16.vlgmr.msra.gmra.mxu1 %vm1605_vm3, %v1604_v26 }
 0x378   : > { %2679 = vmatpush3.bf16.msra.mxu0 %v2963_v30 }
 0x379   : > { %2680 = vmatprep.subr.bf16.mxu0 %v2964_v31 }
 0x37c   : > { %2681 = vmatpush3.bf16.msra.mxu0 %v2965_v1 }
 0x37d   : > { %2682 = vmatprep.subr.bf16.mxu0 %v2966_v32 }
 0x380   : > { %2683 = vmatpush3.bf16.msra.mxu0 %v2967_v33 }
 0x381   : > { %2684 = vmatprep.subr.bf16.mxu0 %v2968_v34 }
 0x384   : > { %2685 = vmatpush3.bf16.msra.mxu0 %v2969_v35 }
 0x385   : > { %2686 = vmatprep.subr.bf16.mxu0 %v2970_v36 }
 0x388   : > { %2687 = vmatpush3.bf16.msra.mxu0 %v2971_v37 }
 0x389   : > { %2688 = vmatprep.subr.bf16.mxu0 %v2972_v38 }
 0x38c   : > { %2689 = vmatpush3.bf16.msra.mxu0 %v2973_v39 }
 0x40e   : > { %v1647_v40 = vpop.f32.mrf.mxu0 }
 0x410   : > { %v2797_v41 = vpop.f32.mrf.mxu0 }
 0x412   : > { %v1650_v42 = vpop.f32.mrf.mxu0 }
 0x414   : > { %v2798_v43 = vpop.f32.mrf.mxu0 }
 0x416   : > { %v1693_v53 = vpop.f32.mrf.mxu1 }
 0x417   : > { %v1983_v60 = vrot.slane %v1693_v53, 7 }
 0x418   : > { %v2803_v44 = vpop.f32.mrf.mxu1 }
 0x419   : > { %v1985_v6 = vsel %vm1984_vm4, %v1983_v60, %v1647_v40 }
 0x41a   : > { %v1696_v45 = vpop.f32.mrf.mxu1 }
 0x41c   : > { %v2804_v46 = vpop.f32.mrf.mxu1 }
 0x41e   : > { %v1739_v47 = vpop.f32.mrf.mxu0 }
 0x41f   : > { %v1986_v63 = vrot.slane %v1739_v47, 6 }
 0x420   : > { %v2809_v50 = vpop.f32.mrf.mxu0 }
 0x421   : > { %v1988_v9 = vsel %vm1987_vm5, %v1986_v63, %v1985_v6 }
 0x422   : > { %v1742_v51 = vpop.f32.mrf.mxu0 }
 0x424   : > { %v2810_v52 = vpop.f32.mrf.mxu0 }
 0x426   : > { %v1831_v55 = vpop.f32.mrf.mxu0  ;;  %v1785_v56 = vpop.f32.mrf.mxu1 }
 0x427   : > { %v1989_v5 = vrot.slane %v1785_v56, 5  ;;  %v1992_v8 = vrot.slane %v1831_v55, 4 }
 0x428   : > { %v2821_v48 = vpop.f32.mrf.mxu0  ;;  %v2815_v57 = vpop.f32.mrf.mxu1 }
 0x429   : > { %v1991_v11 = vsel %vm1990_vm6, %v1989_v5, %v1988_v9 }
 0x42a   : > { %v1834_v58 = vpop.f32.mrf.mxu0  ;;  %v1788_v59 = vpop.f32.mrf.mxu1  ;;  %v1994_v16 = vsel %vm1993_vm7, %v1992_v8, %v1991_v11 }
 0x42c   : > { %v2822_v61 = vpop.f32.mrf.mxu0  ;;  %v2816_v0 = vpop.f32.mrf.mxu1 }
 0x42e   : > { %v1923_v3 = vpop.f32.mrf.mxu0  ;;  %v1877_v4 = vpop.f32.mrf.mxu1 }
 0x42f   : > { %v1995_v12 = vrot.slane %v1877_v4, 3  ;;  %v1998_v18 = vrot.slane %v1923_v3, 2 }
 0x430   : > { %v2833_v7 = vpop.f32.mrf.mxu0  ;;  %v2827_v10 = vpop.f32.mrf.mxu1 }
 0x431   : > { %v1997_v20 = vsel %vm1996_vm8, %v1995_v12, %v1994_v16 }
 0x432   : > { %v1926_v14 = vpop.f32.mrf.mxu0  ;;  %v1880_v15 = vpop.f32.mrf.mxu1  ;;  %v2000_v22 = vsel %vm1999_vm9, %v1998_v18, %v1997_v20 }
 0x434   : > { %v2834_v54 = vpop.f32.mrf.mxu0  ;;  %v2828_v19 = vpop.f32.mrf.mxu1 }
 0x436   : > { %v1969_v62 = vpop.f32.mrf.mxu1 }
 0x437   : > { %v2001_v13 = vrot.slane %v1969_v62, 1 }
 0x438   : > { %v2839_v23 = vpop.f32.mrf.mxu1 }
 0x439   : > { %v2003_v21 = vsel %vm2002_vm10, %v2001_v13, %v2000_v22 }
 0x43a   : > { %v1972_v25 = vpop.f32.mrf.mxu1  ;;  %v2005_v26 = vpack.c.bf16 %v2003_v21, %v2003_v21 }
 0x43c   : > { %v2840_v27 = vpop.f32.mrf.mxu1  ;;  %2173 = vmatprep.mubr.bf16.mxu0 %v2005_v26 }
 0x43d   : > { %2174 = vmatmul.mubr.bf16.vlgmr.msra.gmra.mxu0 %v3363_v49 }
 0x4fd   : > { %v2690_v28 = vpop.f32.mrf.mxu0 }
 0x4ff   : > { %v2691_v29 = vpop.f32.mrf.mxu0 }
 0x500   : > { %v2692_v30 = vadd.f32 %v2691_v29, %v2690_v28 }
 0x501   : > { %v2693_v31 = vpop.f32.mrf.mxu0 }
 0x502   : > { %v2176_v1 = vadd.f32 %v2692_v30, %v2590_v24 }
 0x503   : > { %v2694_v32 = vpop.f32.mrf.mxu0 }
 0x504   : > { %3016 = vtanh.f32 %v2176_v1 }
 0x511   : > { %v3017_v33 = vpop.eup %3016 }
 0x512   : > { %v2182_v34 = vpack.c.bf16 %v3017_v33, %v3017_v33 }
 0x514   : > { %2183 = vst [vmem:[#allocation2] sm:$0xf] %v2182_v34 }
 0x515 PF: > { %p2607_p5 = scmp.ne.s32.totalorder %s3050_s21, 0 }
 0x517   : > { %2189 = sbr.rel (%p2607_p5) target bundleno = 1959 (0x7a7), region = 72 }
 0x51c   : > { %v3019_v2 = vld [vmem:[%s3611_s9 + $0x38] sm:$0xff]   ;;  %v3065_v49 = vmov 0.0   ;;  %v3020_v35 = vld [vmem:[%s3611_s9 + $0x30] sm:$0xff]   ;;  %vm3066_vm12 = vmmov 0   ;;  %v3021_v36 = vld [vmem:[%s3611_s9 + $0x28] sm:$0xff]   ;;  %v3067_v50 = vmov 0  }
 0x51d   : > { %2841 = vmatprep.subr.bf16.mxu0 %v3065_v49  ;;  %2857 = vmatprep.mubr.msk.bf16.mxu0 %vm3066_vm12, %v3065_v49  ;;  %v3022_v37 = vld [vmem:[%s3611_s9 + $0x20] sm:$0xff]   ;;  %v3023_v38 = vld [vmem:[%s3611_s9 + $0x18] sm:$0xff]   ;;  %v3024_v39 = vld [vmem:[%s3611_s9 + $0x10] sm:$0xff]   ;;  %vm2325_vm13 = vcmask 7168  }
 0x51e   : > { %2842 = vmatpush3.bf16.msra.mxu0 %v3019_v2  ;;  %v3025_v40 = vld [vmem:[%s3611_s9 + $0x8] sm:$0xff]   ;;  %v3026_v41 = vld [vmem:[%s3611_s9] sm:$0xff]   ;;  %3018 = vset.pattern.permute.xlu0 %v3067_v50  ;;  %v2309_v63 = vld [vmem:[#allocation5] sm:$0xff] }
 0x51f   : > { %2843 = vmatprep.subr.bf16.mxu0 %v3065_v49  ;;  %v2190_v42 = vld [vmem:[#allocation2] sm:$0xf]  ;;  %v2305_v51 = vld [vmem:[#allocation4] sm:$0xff] }
 0x520   : > { %v2608_v43 = vld [vmem:[%s3612_s10] ss:$0 sm:$0xff] }
 0x522   : > { %2844 = vmatpush3.bf16.msra.mxu0 %v3020_v35 }
 0x523   : > { %2845 = vmatprep.subr.bf16.mxu0 %v3065_v49 }
 0x526   : > { %2846 = vmatpush3.bf16.msra.mxu0 %v3021_v36 }
 0x527   : > { %2847 = vmatprep.subr.bf16.mxu0 %v3065_v49 }
 0x52a   : > { %2848 = vmatpush3.bf16.msra.mxu0 %v3022_v37 }
 0x52b   : > { %2849 = vmatprep.subr.bf16.mxu0 %v3065_v49 }
 0x52e   : > { %2850 = vmatpush3.bf16.msra.mxu0 %v3023_v38 }
 0x52f   : > { %2851 = vmatprep.subr.bf16.mxu0 %v3065_v49 }
 0x532   : > { %2852 = vmatpush3.bf16.msra.mxu0 %v3024_v39 }
 0x533   : > { %2853 = vmatprep.subr.bf16.mxu0 %v3065_v49 }
 0x536   : > { %2854 = vmatpush3.bf16.msra.mxu0 %v3025_v40 }
 0x537   : > { %2855 = vmatprep.subr.bf16.mxu0 %v3065_v49 }
 0x53a   : > { %2856 = vmatpush3.bf16.msra.mxu0 %v3026_v41 }
 0x53d   : > { %2858 = vmatmul.mubr.bf16.vlgmr.msra.gmra.mxu0 %v2190_v42 }
 0x5fd   : > { %v2296_v53 = vpop.f32.mrf.mxu0 }
 0x5fe   : > { %v2297_v44 = vadd.f32 %v2608_v43, %v2296_v53 }
 0x5ff   : > { %v2859_v45 = vpop.f32.mrf.mxu0 }
 0x600   : > { %2304 = vst [vmem:[#allocation3] sm:$0xff] %v2297_v44  ;;  %2306 = vmax.xlane.f32.xlu0 %v2297_v44 }
 0x601   : > { %v2299_v46 = vpop.f32.mrf.mxu0 }
 0x603   : > { %v2860_v47 = vpop.f32.mrf.mxu0 }
 0x689   : > { %v2307_v52 = vpop.xlane.xlu0 %2306 }
 0x68a   : > { %v2308_v55 = vmax.f32 %v2305_v51, %v2307_v52 }
 0x68c   : > { %v2310_v56 = vsub.f32 %v2305_v51, %v2308_v55  ;;  %2327 = vst.msk [vmem:[#allocation4] sm:$0xff] %vm2325_vm13, %v2308_v55  ;;  %2316 = vperm.xlu0 %3018, %v2308_v55  }
 0x68e   : > { %v2311_v60 = vmul.f32 1.442695, %v2310_v56 }
 0x707   : > { %v2317_v48 = vpop.permute.xlu0 %2316 }
 0x708   : > { %v2319_v57 = vsub.f32 %v2297_v44, %v2317_v48 }
 0x70a   : > { %v2320_v58 = vmul.f32 1.442695, %v2319_v57 }
 0x70c   : > { %3027 = vpow2.f32 %v2320_v58 }
 0x70d   : > { %3029 = vpow2.f32 %v2311_v60 }
 0x719   : > { %v3028_v59 = vpop.eup %3027 }
 0x71a   : > { %2322 = vadd.xlane.f32.xlu1 %v3028_v59  ;;  %v3030_v61 = vpop.eup %3029 }
 0x71b   : > { %v2313_v0 = vmul.f32 %v3030_v61, %v2309_v63 }
 0x7a3   : > { %v2323_v5 = vpop.xlane.xlu1 %2322 }
 0x7a4   : > { %v2324_v3 = vadd.f32 %v2323_v5, %v2313_v0 }
 0x7a6   : > { %2326 = vst.msk [vmem:[#allocation5] sm:$0xff] %vm2325_vm13, %v2324_v3 }
 0x7a7 PF: > { %p2617_p6 = scmp.ne.s32.totalorder %s3050_s21, 1 }
 0x7a9   : > { %2331 = sbr.rel (%p2617_p6) target bundleno = 2114 (0x842), region = 76 }
 0x7ae   : > { %v2335_v4 = vld [vmem:[#allocation4] sm:$0xff]  ;;  %v3068_v6 = vmov 0   ;;  %v2344_v7 = vld [vmem:[#allocation5] sm:$0xff]  ;;  %v2334_v9 = vld [vmem:[#allocation3] sm:$0xff] }
 0x7af   : > { %3031 = vset.pattern.permute.xlu0 %v3068_v6 }
 0x7b0   : > { %2338 = vperm.xlu0 %3031, %v2335_v4  }
 0x7b4   : > { %2347 = vperm.xlu0 %3031, %v2344_v7  }
 0x82b   : > { %v2339_v8 = vpop.permute.xlu0 %2338 }
 0x82c   : > { %v2341_v10 = vsub.f32 %v2334_v9, %v2339_v8 }
 0x82e   : > { %v2342_v11 = vmul.f32 1.442695, %v2341_v10 }
 0x82f   : > { %v2348_v12 = vpop.permute.xlu0 %2347 }
 0x830   : > { %3032 = vpow2.f32 %v2342_v11 }
 0x831   : > { %3034 = vrcp.f32 %v2348_v12 }
 0x83d   : > { %v3033_v14 = vpop.eup %3032 }
 0x83e   : > { %v3035_v15 = vpop.eup %3034 }
 0x83f   : > { %v2351_v54 = vmul.f32 %v3035_v15, %v3033_v14 }
 0x841   : > { %2352 = vst [vmem:[%s3613_s11] sm:$0xff] %v2351_v54 }
 0x842 PF: > { %s23_s23 = sadd.s32 1, %s3058_s23   ;;  %s3615_s21 = smov %s3054_s22 }
 0x843   : > { %p20_p7 = scmp.ge.s32.totalorder %s23_s23, 4   ;;  %s3616_s22 = smov %s3618_s24 }
 0x845   :  { %22 = sbr.rel (!%p20_p7) target bundleno = 2 (0x2), region = 132 }

</bundles_post_ra>
